<compile_context>
chip_gen: v6e
topology: v6e:2x2x1
jax: 0.10.0
libtpu: 0.0.40
codegen_flags: <defaults>
</compile_context>

<pallas_src>
import jax
import jax.numpy as jnp
from jax.experimental import pallas as pl
from jax.experimental.pallas import tpu as pltpu

HIDDEN = 500       # hidden width of the PyTorch module
HIDDEN_PAD = 512   # padded to a multiple of 128 lanes for clean MXU/vreg tiling
LANE = 128


def _mlp_kernel(x_ref, w1_ref, b1_ref, w2_ref, b2_ref, w3_ref, b3_ref,
                wo_ref, bo_ref, out_ref):
    # Matmul inputs are bf16, accumulation is f32 (preferred_element_type).
    # Elementwise bias + ReLU stay in f32.
    h = jnp.dot(x_ref[...], w1_ref[...], preferred_element_type=jnp.float32)
    h = jnp.maximum(h + b1_ref[...], 0.0)

    h = jnp.dot(h.astype(jnp.bfloat16), w2_ref[...],
                preferred_element_type=jnp.float32)
    h = jnp.maximum(h + b2_ref[...], 0.0)

    h = jnp.dot(h.astype(jnp.bfloat16), w3_ref[...],
                preferred_element_type=jnp.float32)
    h = jnp.maximum(h + b3_ref[...], 0.0)

    out = jnp.dot(h.astype(jnp.bfloat16), wo_ref[...],
                  preferred_element_type=jnp.float32) + bo_ref[...]
    # Output last dim is padded to a multiple of 128 -> lane-dense stores.
    out_ref[...] = out.astype(out_ref.dtype)


def _round_up(n, m):
    return ((n + m - 1) // m) * m


def _prepare_params(params):
    """Zero-pad hidden 500 -> 512, output -> multiple of 128, and cast weights
    to bf16 (done outside the kernel, once).  Biases stay f32 (tiny, and the
    bias-add runs in f32)."""
    w1, b1, w2, b2, w3, b3, wo, bo = params
    ph = HIDDEN_PAD - HIDDEN
    out_size = wo.shape[1]
    po = _round_up(out_size, LANE) - out_size

    w1p = jnp.pad(w1, ((0, 0), (0, ph))).astype(jnp.bfloat16)
    b1p = jnp.pad(b1, ((0, 0), (0, ph))).astype(jnp.float32)
    w2p = jnp.pad(w2, ((0, ph), (0, ph))).astype(jnp.bfloat16)
    b2p = jnp.pad(b2, ((0, 0), (0, ph))).astype(jnp.float32)
    w3p = jnp.pad(w3, ((0, ph), (0, ph))).astype(jnp.bfloat16)
    b3p = jnp.pad(b3, ((0, 0), (0, ph))).astype(jnp.float32)
    wop = jnp.pad(wo, ((0, ph), (0, po))).astype(jnp.bfloat16)
    bop = jnp.pad(bo, ((0, 0), (0, po))).astype(jnp.float32)
    return (w1p, b1p, w2p, b2p, w3p, b3p, wop, bop)


def mlp_regressor_forward(x, params, batch_tile=256):
    """x: (B, seq, dim) float32 -> (B, output_size) float32."""
    B = x.shape[0]
    x_flat = x.reshape(B, -1)                       # nn.Flatten()
    in_f = x_flat.shape[1]
    out_size = params[6].shape[1]                   # real (un-padded) out dim

    w1, b1, w2, b2, w3, b3, wo, bo = _prepare_params(params)
    H = HIDDEN_PAD
    out_pad = wo.shape[1]                           # lane-dense output width

    # Batch tiling: grid over B (marked "parallel" so v7x's 2 TensorCores can
    # split it); weights use constant index_maps so they stay VMEM-resident
    # across all batch tiles.
    tb = min(batch_tile, _round_up(B, 8))
    b_pad = _round_up(B, tb)
    x_bf16 = x_flat.astype(jnp.bfloat16)
    if b_pad != B:
        x_bf16 = jnp.pad(x_bf16, ((0, b_pad - B), (0, 0)))
    grid = (b_pad // tb,)

    vmem = pltpu.MemorySpace.VMEM

    def whole(shape):
        # whole-array block, resident for the entire call
        return pl.BlockSpec(shape, lambda i: (0, 0), memory_space=vmem)

    out = pl.pallas_call(
        _mlp_kernel,
        out_shape=jax.ShapeDtypeStruct((b_pad, out_pad), jnp.float32),
        grid_spec=pltpu.PrefetchScalarGridSpec(
            num_scalar_prefetch=0,
            grid=grid,
            in_specs=[
                pl.BlockSpec((tb, in_f), lambda i: (i, 0), memory_space=vmem),
                whole((in_f, H)), whole((1, H)),            # layer 1
                whole((H, H)), whole((1, H)),               # layer 2
                whole((H, H)), whole((1, H)),               # layer 3
                whole((H, out_pad)), whole((1, out_pad)),   # output layer
            ],
            out_specs=pl.BlockSpec((tb, out_pad), lambda i: (i, 0),
                                   memory_space=vmem),
        ),
        compiler_params=pltpu.CompilerParams(
            dimension_semantics=("parallel",),
            vmem_limit_bytes=16 << 20,   # actual working set ~3 MiB
        ),
    )(x_bf16, w1, b1, w2, b2, w3, b3, wo, bo)

    return out[:B, :out_size]


def init_params(key, in_features, hidden=HIDDEN, output_size=1):
    """Deterministic synthetic parameter init (uniform, PyTorch-like scale).
    Weights stored as (in_features, out_features) == PyTorch W.T."""
    keys = jax.random.split(key, 8)

    def lin(kw, kb, fan_in, fan_out):
        bound = 1.0 / jnp.sqrt(fan_in)
        w = jax.random.uniform(kw, (fan_in, fan_out), jnp.float32, -bound, bound)
        b = jax.random.uniform(kb, (1, fan_out), jnp.float32, -bound, bound)
        return w, b

    w1, b1 = lin(keys[0], keys[1], in_features, hidden)
    w2, b2 = lin(keys[2], keys[3], hidden, hidden)
    w3, b3 = lin(keys[4], keys[5], hidden, hidden)
    wo, bo = lin(keys[6], keys[7], hidden, output_size)
    return (w1, b1, w2, b2, w3, b3, wo, bo)


def reference_forward_f32(x, params):
    """Pure-JAX f32 reference (true module semantics, eval mode)."""
    w1, b1, w2, b2, w3, b3, wo, bo = params
    h = x.reshape(x.shape[0], -1)
    h = jnp.maximum(h @ w1 + b1, 0.0)
    h = jnp.maximum(h @ w2 + b2, 0.0)
    h = jnp.maximum(h @ w3 + b3, 0.0)
    return h @ wo + bo


def reference_forward_bf16(x, params):
    """Pure-JAX reference mirroring the kernel's bf16-weight / f32-acc math."""
    w1, b1, w2, b2, w3, b3, wo, bo = _prepare_params(params)
    out_size = params[6].shape[1]
    h = x.reshape(x.shape[0], -1).astype(jnp.bfloat16)
    h = jnp.maximum(jnp.dot(h, w1, preferred_element_type=jnp.float32) + b1, 0.0)
    h = jnp.maximum(jnp.dot(h.astype(jnp.bfloat16), w2,
                            preferred_element_type=jnp.float32) + b2, 0.0)
    h = jnp.maximum(jnp.dot(h.astype(jnp.bfloat16), w3,
                            preferred_element_type=jnp.float32) + b3, 0.0)
    out = jnp.dot(h.astype(jnp.bfloat16), wo,
                  preferred_element_type=jnp.float32) + bo
    return out[:, :out_size]


if __name__ == "__main__":
    # Small shapes consistent with the module: sequence_len=8, dimension_num=4
    B, seq_len, dim_num, out_size = 8, 8, 4, 1
    in_features = seq_len * dim_num

    key = jax.random.PRNGKey(0)
    kx, kp = jax.random.split(key)
    x = jax.random.normal(kx, (B, seq_len, dim_num), jnp.float32)
    params = init_params(kp, in_features, hidden=HIDDEN, output_size=out_size)

    out = mlp_regressor_forward(x, params)
    out = jax.block_until_ready(out)
    assert out.shape == (B, out_size), out.shape

    # Tight check vs. a reference using identical bf16-weight / f32-acc math.
    ref_bf16 = reference_forward_bf16(x, params)
    assert jnp.allclose(out, ref_bf16, atol=1e-2, rtol=1e-2), (
        "mismatch vs bf16 reference: "
        f"{float(jnp.max(jnp.abs(out - ref_bf16)))}")

    # Loose check vs. the full-f32 module semantics (bf16 weight quantization
    # error only).
    ref_f32 = reference_forward_f32(x, params)
    assert jnp.allclose(out, ref_f32, atol=5e-2, rtol=5e-2), (
        "mismatch vs f32 reference: "
        f"{float(jnp.max(jnp.abs(out - ref_f32)))}")

    print("KERNEL_OK")
</pallas_src>

<mosaic_0001>
module attributes {stable_mosaic.version = 11 : i64} {
  func.func @_mlp_kernel(%arg0: i32, %arg1: memref<8x32xbf16, #tpu.memory_space<vmem>>, %arg2: memref<32x512xbf16, #tpu.memory_space<vmem>>, %arg3: memref<1x512xf32, #tpu.memory_space<vmem>>, %arg4: memref<512x512xbf16, #tpu.memory_space<vmem>>, %arg5: memref<1x512xf32, #tpu.memory_space<vmem>>, %arg6: memref<512x512xbf16, #tpu.memory_space<vmem>>, %arg7: memref<1x512xf32, #tpu.memory_space<vmem>>, %arg8: memref<512x128xbf16, #tpu.memory_space<vmem>>, %arg9: memref<1x128xf32, #tpu.memory_space<vmem>>, %arg10: memref<8x128xf32, #tpu.memory_space<vmem>>) attributes {dimension_semantics = [#tpu.dimension_semantics<parallel>], iteration_bounds = array<i64: 1>, scalar_prefetch = 0 : i64, scratch_operands = 0 : i64, tpu.core_type = #tpu.core_type<tc>, window_params = [{transform_indices = @transform_0, window_bounds = array<i64: 8, 32>}, {pipeline_mode = #tpu.pipeline_mode<synchronous>, transform_indices = @transform_1, window_bounds = array<i64: 32, 512>}, {pipeline_mode = #tpu.pipeline_mode<synchronous>, transform_indices = @transform_2, window_bounds = array<i64: 1, 512>}, {pipeline_mode = #tpu.pipeline_mode<synchronous>, transform_indices = @transform_3, window_bounds = array<i64: 512, 512>}, {pipeline_mode = #tpu.pipeline_mode<synchronous>, transform_indices = @transform_4, window_bounds = array<i64: 1, 512>}, {pipeline_mode = #tpu.pipeline_mode<synchronous>, transform_indices = @transform_5, window_bounds = array<i64: 512, 512>}, {pipeline_mode = #tpu.pipeline_mode<synchronous>, transform_indices = @transform_6, window_bounds = array<i64: 1, 512>}, {pipeline_mode = #tpu.pipeline_mode<synchronous>, transform_indices = @transform_7, window_bounds = array<i64: 512, 128>}, {pipeline_mode = #tpu.pipeline_mode<synchronous>, transform_indices = @transform_8, window_bounds = array<i64: 1, 128>}, {transform_indices = @transform_9, window_bounds = array<i64: 8, 128>}]} {
    %c0 = arith.constant 0 : index
    %c0_0 = arith.constant 0 : index
    %0 = vector.load %arg1[%c0, %c0_0] : memref<8x32xbf16, #tpu.memory_space<vmem>>, vector<8x32xbf16>
    %c0_1 = arith.constant 0 : index
    %c0_2 = arith.constant 0 : index
    %1 = vector.load %arg2[%c0_1, %c0_2] : memref<32x512xbf16, #tpu.memory_space<vmem>>, vector<32x512xbf16>
    %cst = arith.constant dense<0.000000e+00> : vector<8x512xf32>
    %2 = tpu.matmul %0, %1, %cst {dimension_numbers = #tpu.dot_dimension_numbers<[1], [0], [0], [1], [0, 0, 1, 1], [], []>} : vector<8x32xbf16>, vector<32x512xbf16>, vector<8x512xf32> -> vector<8x512xf32>
    %c0_3 = arith.constant 0 : index
    %c0_4 = arith.constant 0 : index
    %3 = vector.load %arg3[%c0_3, %c0_4] : memref<1x512xf32, #tpu.memory_space<vmem>>, vector<1x512xf32>
    %4 = vector.broadcast %3 : vector<1x512xf32> to vector<8x512xf32>
    %5 = arith.addf %2, %4 : vector<8x512xf32>
    %cst_5 = arith.constant 0.000000e+00 : f32
    %6 = vector.broadcast %cst_5 : f32 to vector<8x512xf32>
    %7 = arith.maximumf %5, %6 : vector<8x512xf32>
    %8 = arith.truncf %7 : vector<8x512xf32> to vector<8x512xbf16>
    %c0_6 = arith.constant 0 : index
    %c0_7 = arith.constant 0 : index
    %9 = vector.load %arg4[%c0_6, %c0_7] : memref<512x512xbf16, #tpu.memory_space<vmem>>, vector<512x512xbf16>
    %cst_8 = arith.constant dense<0.000000e+00> : vector<8x512xf32>
    %10 = tpu.matmul %8, %9, %cst_8 {dimension_numbers = #tpu.dot_dimension_numbers<[1], [0], [0], [1], [0, 0, 1, 1], [], []>} : vector<8x512xbf16>, vector<512x512xbf16>, vector<8x512xf32> -> vector<8x512xf32>
    %c0_9 = arith.constant 0 : index
    %c0_10 = arith.constant 0 : index
    %11 = vector.load %arg5[%c0_9, %c0_10] : memref<1x512xf32, #tpu.memory_space<vmem>>, vector<1x512xf32>
    %12 = vector.broadcast %11 : vector<1x512xf32> to vector<8x512xf32>
    %13 = arith.addf %10, %12 : vector<8x512xf32>
    %cst_11 = arith.constant 0.000000e+00 : f32
    %14 = vector.broadcast %cst_11 : f32 to vector<8x512xf32>
    %15 = arith.maximumf %13, %14 : vector<8x512xf32>
    %16 = arith.truncf %15 : vector<8x512xf32> to vector<8x512xbf16>
    %c0_12 = arith.constant 0 : index
    %c0_13 = arith.constant 0 : index
    %17 = vector.load %arg6[%c0_12, %c0_13] : memref<512x512xbf16, #tpu.memory_space<vmem>>, vector<512x512xbf16>
    %cst_14 = arith.constant dense<0.000000e+00> : vector<8x512xf32>
    %18 = tpu.matmul %16, %17, %cst_14 {dimension_numbers = #tpu.dot_dimension_numbers<[1], [0], [0], [1], [0, 0, 1, 1], [], []>} : vector<8x512xbf16>, vector<512x512xbf16>, vector<8x512xf32> -> vector<8x512xf32>
    %c0_15 = arith.constant 0 : index
    %c0_16 = arith.constant 0 : index
    %19 = vector.load %arg7[%c0_15, %c0_16] : memref<1x512xf32, #tpu.memory_space<vmem>>, vector<1x512xf32>
    %20 = vector.broadcast %19 : vector<1x512xf32> to vector<8x512xf32>
    %21 = arith.addf %18, %20 : vector<8x512xf32>
    %cst_17 = arith.constant 0.000000e+00 : f32
    %22 = vector.broadcast %cst_17 : f32 to vector<8x512xf32>
    %23 = arith.maximumf %21, %22 : vector<8x512xf32>
    %24 = arith.truncf %23 : vector<8x512xf32> to vector<8x512xbf16>
    %c0_18 = arith.constant 0 : index
    %c0_19 = arith.constant 0 : index
    %25 = vector.load %arg8[%c0_18, %c0_19] : memref<512x128xbf16, #tpu.memory_space<vmem>>, vector<512x128xbf16>
    %cst_20 = arith.constant dense<0.000000e+00> : vector<8x128xf32>
    %26 = tpu.matmul %24, %25, %cst_20 {dimension_numbers = #tpu.dot_dimension_numbers<[1], [0], [0], [1], [0, 0, 1, 1], [], []>} : vector<8x512xbf16>, vector<512x128xbf16>, vector<8x128xf32> -> vector<8x128xf32>
    %c0_21 = arith.constant 0 : index
    %c0_22 = arith.constant 0 : index
    %27 = vector.load %arg9[%c0_21, %c0_22] : memref<1x128xf32, #tpu.memory_space<vmem>>, vector<1x128xf32>
    %28 = vector.broadcast %27 : vector<1x128xf32> to vector<8x128xf32>
    %29 = arith.addf %26, %28 : vector<8x128xf32>
    %c0_23 = arith.constant 0 : index
    %c0_24 = arith.constant 0 : index
    %30 = vector.load %arg10[%c0_23, %c0_24] : memref<8x128xf32, #tpu.memory_space<vmem>>, vector<8x128xf32>
    tpu.vector_store %arg10[%c0_23, %c0_24], %29 {strides = array<i32>} : memref<8x128xf32, #tpu.memory_space<vmem>>, vector<8x128xf32>,
    return
  }
  func.func @transform_0(%arg0: i32) -> (i32, i32) {
    %c0_i32 = arith.constant 0 : i32
    %c0_i32_0 = arith.constant 0 : i32
    return %arg0, %c0_i32 : i32, i32
  }
  func.func @transform_1(%arg0: i32) -> (i32, i32) {
    %c0_i32 = arith.constant 0 : i32
    %c0_i32_0 = arith.constant 0 : i32
    %c0_i32_1 = arith.constant 0 : i32
    return %c0_i32, %c0_i32_0 : i32, i32
  }
  func.func @transform_2(%arg0: i32) -> (i32, i32) {
    %c0_i32 = arith.constant 0 : i32
    %c0_i32_0 = arith.constant 0 : i32
    %c0_i32_1 = arith.constant 0 : i32
    return %c0_i32, %c0_i32_0 : i32, i32
  }
  func.func @transform_3(%arg0: i32) -> (i32, i32) {
    %c0_i32 = arith.constant 0 : i32
    %c0_i32_0 = arith.constant 0 : i32
    %c0_i32_1 = arith.constant 0 : i32
    return %c0_i32, %c0_i32_0 : i32, i32
  }
  func.func @transform_4(%arg0: i32) -> (i32, i32) {
    %c0_i32 = arith.constant 0 : i32
    %c0_i32_0 = arith.constant 0 : i32
    %c0_i32_1 = arith.constant 0 : i32
    return %c0_i32, %c0_i32_0 : i32, i32
  }
  func.func @transform_5(%arg0: i32) -> (i32, i32) {
    %c0_i32 = arith.constant 0 : i32
    %c0_i32_0 = arith.constant 0 : i32
    %c0_i32_1 = arith.constant 0 : i32
    return %c0_i32, %c0_i32_0 : i32, i32
  }
  func.func @transform_6(%arg0: i32) -> (i32, i32) {
    %c0_i32 = arith.constant 0 : i32
    %c0_i32_0 = arith.constant 0 : i32
    %c0_i32_1 = arith.constant 0 : i32
    return %c0_i32, %c0_i32_0 : i32, i32
  }
  func.func @transform_7(%arg0: i32) -> (i32, i32) {
    %c0_i32 = arith.constant 0 : i32
    %c0_i32_0 = arith.constant 0 : i32
    %c0_i32_1 = arith.constant 0 : i32
    return %c0_i32, %c0_i32_0 : i32, i32
  }
  func.func @transform_8(%arg0: i32) -> (i32, i32) {
    %c0_i32 = arith.constant 0 : i32
    %c0_i32_0 = arith.constant 0 : i32
    %c0_i32_1 = arith.constant 0 : i32
    return %c0_i32, %c0_i32_0 : i32, i32
  }
  func.func @transform_9(%arg0: i32) -> (i32, i32) {
    %c0_i32 = arith.constant 0 : i32
    %c0_i32_0 = arith.constant 0 : i32
    return %arg0, %c0_i32 : i32, i32
  }
}

</mosaic_0001>

<bundles_post_ra>
// kernel: tpu_custom_call.1
= control target key start
LH: loop header
LB: loop body
LE: loop exit
PB: predicated region body
PF: predicated region fallthrough
CT: control target
= control target key end

     0   :  { %14 = vsyncpa [#allocation3], 0  ;;  %s3639_s0 = inlined_call_operand.hbm [shape: bf16[8,32], index: 0, kind: input, shape index: {}]   ;;  %s3640_s1 = inlined_call_operand.hbm [shape: bf16[32,512], index: 1, kind: input, shape index: {}]   ;;  %s3641_s2 = inlined_call_operand.hbm [shape: f32[1,512], index: 2, kind: input, shape index: {}]   ;;  %s3642_s3 = inlined_call_operand.hbm [shape: bf16[512,512], index: 3, kind: input, shape index: {}]   ;;  %s3643_s4 = inlined_call_operand.vmem [shape: f32[1,512], index: 4, kind: input, shape index: {}]   ;;  %s3644_s5 = inlined_call_operand.hbm [shape: bf16[512,512], index: 5, kind: input, shape index: {}]   ;;  %s3645_s6 = inlined_call_operand.vmem [shape: f32[1,512], index: 6, kind: input, shape index: {}]   ;;  %s3646_s7 = inlined_call_operand.hbm [shape: bf16[512,128], index: 7, kind: input, shape index: {}]   ;;  %s3647_s8 = inlined_call_operand.vmem [shape: f32[1,128], index: 8, kind: input, shape index: {}]   ;;  %s3648_s9 = inlined_call_operand.hbm [shape: f32[8,128], index: 9, kind: output, shape index: {}]  }
   0x1   :  { %15 = vsyncpa [#allocation6], 0 }
   0x2   :  { %16 = vsyncpa [#allocation9], 0 }
   0x3   :  { %17 = vsyncpa [#allocation12], 0 }
   0x4   :  { %18 = vsyncpa [#allocation4], 0  ;;  %s3496_s30 = smov [#allocation5]  }
   0x5   :  { %s34_s10 = sshll.u32 %s3496_s30, 4  ;;  %s35_s10 = int_to_ptr.vmem [resolvable:$true] %s34_s10 }
   0x6   :  { %s3354_s11 = scalar_lea.vmem %s35_s10, 1024  ;;  %p3359_p1 = scmp.lt.s32.totalorder %s35_s10, %s35_s10 }
   0x7   :  { %p3355_p0 = scmp.ne.s32.totalorder %s35_s10, %s3354_s11  ;;  %p3360_p2 = scmp.lt.s32.totalorder %s3354_s11, %s3354_s11 }
   0x9   :  { %p3361_p3 = por %p3360_p2, %p3359_p1 }
   0xb   :  { %p3362_p4 = pnand %p3361_p3, %p3355_p0 }
   0xd   :  { %3365 = shalt.err (!%p3362_p4)
}
   0xe   :  { %s3497_s12 = smov 256   ;;  %s3498_s13 = smov 16  }
   0xf   :  { %40 = dma.hbm_to_vmem [thread:$0]  %s3640_s1, 1024, %s35_s10, [#allocation6], %s3497_s12, %s3497_s12, %s3498_s13  }
  0x10   :  { %s3499_s16 = smov [#allocation8]   ;;  %s3500_s18 = smov [#allocation2]  }
  0x11   :  { %s56_s17 = sshll.u32 %s3499_s16, 4  ;;  %s25_s19 = sshll.u32 %s3500_s18, 4  ;;  %s57_s17 = int_to_ptr.vmem [resolvable:$true] %s56_s17  ;;  %s26_s19 = int_to_ptr.vmem [resolvable:$true] %s25_s19 }
  0x12   :  { %s3374_s20 = scalar_lea.vmem %s57_s17, 16384  ;;  %p3379_p6 = scmp.lt.s32.totalorder %s57_s17, %s57_s17 }
  0x13   :  { %p3375_p5 = scmp.ne.s32.totalorder %s57_s17, %s3374_s20  ;;  %p3380_p7 = scmp.lt.s32.totalorder %s3374_s20, %s3374_s20 }
  0x15   :  { %p3381_p8 = por %p3380_p7, %p3379_p6 }
  0x17   :  { %p3382_p9 = pnand %p3381_p8, %p3375_p5 }
  0x19   :  { %3385 = shalt.err (!%p3382_p9)
}
  0x1a   :  { %62 = dma.hbm_to_vmem [thread:$0]  %s3642_s3, 16384, %s57_s17, [#allocation9], %s3497_s12, %s3497_s12, %s3498_s13  }
  0x1b   :  { %s3394_s1 = scalar_lea.vmem %s26_s19, 64  ;;  %p3399_p11 = scmp.lt.s32.totalorder %s26_s19, %s26_s19 }
  0x1c   :  { %p3395_p10 = scmp.ne.s32.totalorder %s26_s19, %s3394_s1  ;;  %p3400_p12 = scmp.lt.s32.totalorder %s3394_s1, %s3394_s1 }
  0x1e   :  { %p3401_p13 = por %p3400_p12, %p3399_p11 }
  0x20   :  { %p3402_p0 = pnand %p3401_p13, %p3395_p10 }
  0x22   :  { %3405 = shalt.err (!%p3402_p0)
}
  0x23   :  { %28 = dma.hbm_to_vmem [thread:$0]  %s3639_s0, 64, %s26_s19, [#allocation3]  }
  0x24   :  { %s3501_s25 = smov [#allocation7]   ;;  %s3502_s27 = smov [#allocation10]  }
  0x25   :  { %s47_s26 = sshll.u32 %s3501_s25, 4  ;;  %s70_s28 = sshll.u32 %s3502_s27, 4  ;;  %s48_s26 = int_to_ptr.vmem [resolvable:$true] %s47_s26  ;;  %s71_s28 = int_to_ptr.vmem [resolvable:$true] %s70_s28 }
  0x26   :  { %s3414_s29 = scalar_lea.vmem %s48_s26, 64  ;;  %p3419_p2 = scmp.lt.s32.totalorder %s48_s26, %s48_s26 }
  0x27   :  { %p3415_p1 = scmp.ne.s32.totalorder %s48_s26, %s3414_s29  ;;  %p3420_p3 = scmp.lt.s32.totalorder %s3414_s29, %s3414_s29 }
  0x29   :  { %p3421_p4 = por %p3420_p3, %p3419_p2 }
  0x2b   :  { %p3422_p5 = pnand %p3421_p4, %p3415_p1 }
  0x2d   :  { %3425 = shalt.err (!%p3422_p5)
}
  0x2e   :  { %50 = dma.hbm_to_vmem [thread:$0]  %s3641_s2, 64, %s48_s26, [#allocation6]  }
  0x2f   :  { %s3434_s10 = scalar_lea.vmem %s71_s28, 16384  ;;  %p3439_p7 = scmp.lt.s32.totalorder %s71_s28, %s71_s28 }
  0x30   :  { %p3435_p6 = scmp.ne.s32.totalorder %s71_s28, %s3434_s10  ;;  %p3440_p8 = scmp.lt.s32.totalorder %s3434_s10, %s3434_s10 }
  0x32   :  { %p3441_p9 = por %p3440_p8, %p3439_p7 }
  0x34   :  { %p3442_p10 = pnand %p3441_p9, %p3435_p6 }
  0x36   :  { %3445 = shalt.err (!%p3442_p10)
}
  0x37   :  { %76 = dma.hbm_to_vmem [thread:$0]  %s3644_s5, 16384, %s71_s28, [#allocation9], %s3497_s12, %s3497_s12, %s3498_s13  }
  0x38   :  { %s3503_s14 = smov [#allocation11]  }
  0x39   :  { %s84_s15 = sshll.u32 %s3503_s14, 4  ;;  %s85_s15 = int_to_ptr.vmem [resolvable:$true] %s84_s15 }
  0x3a   :  { %s3454_s16 = scalar_lea.vmem %s85_s15, 4096  ;;  %p3459_p12 = scmp.lt.s32.totalorder %s85_s15, %s85_s15 }
  0x3b   :  { %p3455_p11 = scmp.ne.s32.totalorder %s85_s15, %s3454_s16  ;;  %p3460_p13 = scmp.lt.s32.totalorder %s3454_s16, %s3454_s16 }
  0x3d   :  { %p3461_p0 = por %p3460_p13, %p3459_p12 }
  0x3f   :  { %p3462_p1 = pnand %p3461_p0, %p3455_p11 }
  0x41   :  { %3465 = shalt.err (!%p3462_p1)
}
  0x42   :  { %s3504_s2 = smov 64   ;;  %s3505_s17 = smov 4  }
  0x43   :  { %90 = dma.hbm_to_vmem [thread:$0]  %s3646_s7, 4096, %s85_s15, [#allocation12], %s3504_s2, %s3504_s2, %s3505_s17  }
  0x44   :  { %3486 = dma.done.wait [#allocation3], 64  }
  0x45   :  { %3487 = vsyncadd [#allocation3], 4294967232 }
  0x46   :  { %3488 = dma.done.wait [#allocation6], 1088  }
  0x47   :  { %3489 = vsyncadd [#allocation6], 4294966208 }
  0x48   :  { %3490 = dma.done.wait [#allocation9], 32768  }
  0x49   :  { %3491 = vsyncadd [#allocation9], 4294934528 }
  0x4a   :  { %3492 = dma.done.wait [#allocation12], 4096  }
  0x4b   :  { %3493 = vsyncadd [#allocation12], 4294963200  ;;  %v3506_v0 = vmov 0   ;;  %v2918_v1 = vld [vmem:[#allocation5 + $0x24] ss:$16 sps:$4 sm:$0xff]   ;;  %vm183_vm0 = vcmask 261120  }
  0x4c   :  { %219 = vmatprep.mubr.bf16.mxu0 %v3506_v0  ;;  %260 = vmatprep.mubr.bf16.mxu1 %v3506_v0  ;;  %v2920_v2 = vld [vmem:[#allocation5 + $0x2c] ss:$16 sps:$4 sm:$0xff]   ;;  %v2922_v3 = vld [vmem:[#allocation5 + $0x20] ss:$16 sps:$4 sm:$0xff]   ;;  %v2923_v4 = vld [vmem:[#allocation5 + $0x28] ss:$16 sps:$4 sm:$0xff]  }
  0x4d   :  { %199 = vmatprep.subr.bf16.mxu0 %v2918_v1  ;;  %240 = vmatprep.subr.bf16.mxu1 %v2920_v2  ;;  %v2924_v5 = vld [vmem:[#allocation5 + $0x4] ss:$16 sps:$4 sm:$0xff]   ;;  %v2926_v6 = vld [vmem:[#allocation5 + $0xc] ss:$16 sps:$4 sm:$0xff]   ;;  %v2928_v7 = vld [vmem:[#allocation5] ss:$16 sps:$4 sm:$0xff]  }
  0x4e   :  { %200 = vmatpush1.bf16.msra.mxu0 %v2922_v3  ;;  %241 = vmatpush1.bf16.msra.mxu1 %v2923_v4  ;;  %v2929_v8 = vld [vmem:[#allocation5 + $0x8] ss:$16 sps:$4 sm:$0xff]   ;;  %v112_v9 = vld [vmem:[#allocation2] sm:$0xf]  ;;  %v2930_v10 = vld [vmem:[#allocation8 + $0xe0] ss:$16 sps:$4 sm:$0xff]  }
  0x4f   :  { %201 = vmatprep.subr.bf16.mxu0 %v2924_v5  ;;  %242 = vmatprep.subr.bf16.mxu1 %v2926_v6  ;;  %v2932_v11 = vld [vmem:[#allocation8 + $0xe4] ss:$16 sps:$4 sm:$0xff]   ;;  %v2933_v12 = vld [vmem:[#allocation8 + $0x2e0] ss:$16 sps:$4 sm:$0xff]   ;;  %s3507_s20 = smov [#allocation13]  }
  0x50   :  { %v2935_v13 = vld [vmem:[#allocation8 + $0x2e4] ss:$16 sps:$4 sm:$0xff]   ;;  %v2936_v16 = vld [vmem:[#allocation8 + $0xc0] ss:$16 sps:$4 sm:$0xff]   ;;  %s2551_s21 = sshll.u32 %s3507_s20, 4  ;;  %s2552_s21 = int_to_ptr.vmem [resolvable:$true] %s2551_s21 }
  0x51   :  { %v2938_v14 = vld [vmem:[#allocation8 + $0xc4] ss:$16 sps:$4 sm:$0xff]   ;;  %v2939_v17 = vld [vmem:[#allocation8 + $0x2c0] ss:$16 sps:$4 sm:$0xff]   ;;  %s3466_s22 = scalar_lea.vmem %s2552_s21, 128  ;;  %p3471_p3 = scmp.lt.s32.totalorder %s2552_s21, %s2552_s21 }
  0x52   :  { %202 = vmatpush1.bf16.msra.mxu0 %v2928_v7  ;;  %243 = vmatpush1.bf16.msra.mxu1 %v2929_v8  ;;  %v2941_v15 = vld [vmem:[#allocation8 + $0x2c4] ss:$16 sps:$4 sm:$0xff]   ;;  %v2942_v20 = vld [vmem:[#allocation8 + $0xa0] ss:$16 sps:$4 sm:$0xff]   ;;  %p3467_p2 = scmp.ne.s32.totalorder %s2552_s21, %s3466_s22  ;;  %p3472_p4 = scmp.lt.s32.totalorder %s3466_s22, %s3466_s22 }
  0x53   :  { %1067 = vmatprep.subr.bf16.mxu0 %v2932_v11  ;;  %1108 = vmatprep.subr.bf16.mxu1 %v2935_v13  ;;  %v2944_v18 = vld [vmem:[#allocation8 + $0xa4] ss:$16 sps:$4 sm:$0xff]   ;;  %v2945_v21 = vld [vmem:[#allocation8 + $0x2a0] ss:$16 sps:$4 sm:$0xff]   ;;  %v3031_v11 = vld [vmem:[#allocation8 + $0x2ec] ss:$16 sps:$4 sm:$0xff]  }
  0x54   :  { %v2947_v19 = vld [vmem:[#allocation8 + $0x2a4] ss:$16 sps:$4 sm:$0xff]   ;;  %v2948_v24 = vld [vmem:[#allocation8 + $0x80] ss:$16 sps:$4 sm:$0xff]   ;;  %p3473_p5 = por %p3472_p4, %p3471_p3 }
  0x55   :  { %2571 = vmatmul.mubr.msk.bf16.vlgmr.msra.gmra.mxu0 %vm183_vm0, %v112_v9  ;;  %2572 = vmatmul.mubr.msk.bf16.vlgmr.msra.gmra.mxu1 %vm183_vm0, %v112_v9  ;;  %v2950_v22 = vld [vmem:[#allocation8 + $0x84] ss:$16 sps:$4 sm:$0xff]   ;;  %v2951_v25 = vld [vmem:[#allocation8 + $0x280] ss:$16 sps:$4 sm:$0xff]  }
  0x56   :  { %1068 = vmatpush1.bf16.msra.mxu0 %v2930_v10  ;;  %1109 = vmatpush1.bf16.msra.mxu1 %v2933_v12  ;;  %v2953_v23 = vld [vmem:[#allocation8 + $0x284] ss:$16 sps:$4 sm:$0xff]   ;;  %v2954_v28 = vld [vmem:[#allocation8 + $0x60] ss:$16 sps:$4 sm:$0xff]   ;;  %v3028_v10 = vld [vmem:[#allocation8 + $0xec] ss:$16 sps:$4 sm:$0xff]   ;;  %v123_v12 = vlaneseq  ;;  %p3474_p6 = pnand %p3473_p5, %p3467_p2 }
  0x57   :  { %1069 = vmatprep.subr.bf16.mxu0 %v2938_v14  ;;  %1110 = vmatprep.subr.bf16.mxu1 %v2941_v15  ;;  %v2956_v26 = vld [vmem:[#allocation8 + $0x64] ss:$16 sps:$4 sm:$0xff]   ;;  %v2957_v29 = vld [vmem:[#allocation8 + $0x260] ss:$16 sps:$4 sm:$0xff]  }
  0x58   :  { %v2959_v27 = vld [vmem:[#allocation8 + $0x264] ss:$16 sps:$4 sm:$0xff]   ;;  %v2960_v32 = vld [vmem:[#allocation8 + $0x40] ss:$16 sps:$4 sm:$0xff]   ;;  %v124_v13 = vshrl.u32 %v123_v12, 7 }
  0x59   :  { %v2962_v30 = vld [vmem:[#allocation8 + $0x44] ss:$16 sps:$4 sm:$0xff]   ;;  %v2963_v33 = vld [vmem:[#allocation8 + $0x240] ss:$16 sps:$4 sm:$0xff]   ;;  %v3077_v12 = vld [vmem:[#allocation8 + $0x3e8] ss:$16 sps:$4 sm:$0xff]  }
  0x5a   :  { %1070 = vmatpush1.bf16.msra.mxu0 %v2936_v16  ;;  %1111 = vmatpush1.bf16.msra.mxu1 %v2939_v17  ;;  %v2965_v31 = vld [vmem:[#allocation8 + $0x244] ss:$16 sps:$4 sm:$0xff]   ;;  %v2966_v36 = vld [vmem:[#allocation8 + $0x20] ss:$16 sps:$4 sm:$0xff]   ;;  %v3585_v14 = vsub.s32 0, %v124_v13  ;;  %v3587_v15 = vsub.s32 2, %v124_v13 }
  0x5b   :  { %1071 = vmatprep.subr.bf16.mxu0 %v2944_v18  ;;  %1112 = vmatprep.subr.bf16.mxu1 %v2947_v19  ;;  %v2968_v34 = vld [vmem:[#allocation8 + $0x24] ss:$16 sps:$4 sm:$0xff]   ;;  %v2969_v37 = vld [vmem:[#allocation8 + $0x220] ss:$16 sps:$4 sm:$0xff]   ;;  %v121_v16 = vld [vmem:[#allocation7] sm:$0xf] }
  0x5c   :  { %v2971_v35 = vld [vmem:[#allocation8 + $0x224] ss:$16 sps:$4 sm:$0xff]   ;;  %v2972_v40 = vld [vmem:[#allocation8] ss:$16 sps:$4 sm:$0xff]   ;;  %v3589_v17 = vsub.s32 1, %v124_v13  ;;  %v3591_v18 = vsub.s32 3, %v124_v13  ;;  %v126_v19 = vrot.slane %v121_v16, %v3585_v14 }
  0x5d   :  { %v2974_v38 = vld [vmem:[#allocation8 + $0x4] ss:$16 sps:$4 sm:$0xff]   ;;  %v2975_v41 = vld [vmem:[#allocation8 + $0x200] ss:$16 sps:$4 sm:$0xff]   ;;  %v3082_v13 = vld [vmem:[#allocation8 + $0x1cc] ss:$16 sps:$4 sm:$0xff]  }
  0x5e   :  { %1072 = vmatpush1.bf16.msra.mxu0 %v2942_v20  ;;  %1113 = vmatpush1.bf16.msra.mxu1 %v2945_v21  ;;  %v2977_v39 = vld [vmem:[#allocation8 + $0x204] ss:$16 sps:$4 sm:$0xff]   ;;  %v2978_v44 = vld [vmem:[#allocation8 + $0x1e0] ss:$16 sps:$4 sm:$0xff]   ;;  %v134_v20 = vrot.slane %v121_v16, %v3587_v15  ;;  %v130_v21 = vrot.slane %v121_v16, %v3589_v17 }
  0x5f   :  { %1073 = vmatprep.subr.bf16.mxu0 %v2950_v22  ;;  %1114 = vmatprep.subr.bf16.mxu1 %v2953_v23  ;;  %v2980_v42 = vld [vmem:[#allocation8 + $0x1e4] ss:$16 sps:$4 sm:$0xff]   ;;  %v2981_v45 = vld [vmem:[#allocation8 + $0x3e0] ss:$16 sps:$4 sm:$0xff]   ;;  %v138_v22 = vrot.slane %v121_v16, %v3591_v18  ;;  %v3085_v16 = vld [vmem:[#allocation8 + $0x3cc] ss:$16 sps:$4 sm:$0xff]  }
  0x60   :  { %v2983_v43 = vld [vmem:[#allocation8 + $0x3e4] ss:$16 sps:$4 sm:$0xff]   ;;  %v2984_v48 = vld [vmem:[#allocation8 + $0x1c0] ss:$16 sps:$4 sm:$0xff]  }
  0x61   :  { %v2986_v46 = vld [vmem:[#allocation8 + $0x1c4] ss:$16 sps:$4 sm:$0xff]   ;;  %v2987_v49 = vld [vmem:[#allocation8 + $0x3c0] ss:$16 sps:$4 sm:$0xff]  }
  0x62   :  { %1074 = vmatpush1.bf16.msra.mxu0 %v2948_v24  ;;  %1115 = vmatpush1.bf16.msra.mxu1 %v2951_v25  ;;  %v2989_v47 = vld [vmem:[#allocation8 + $0x3c4] ss:$16 sps:$4 sm:$0xff]   ;;  %v2990_v52 = vld [vmem:[#allocation8 + $0x1a0] ss:$16 sps:$4 sm:$0xff]  }
  0x63   :  { %1075 = vmatprep.subr.bf16.mxu0 %v2956_v26  ;;  %1116 = vmatprep.subr.bf16.mxu1 %v2959_v27  ;;  %v2992_v50 = vld [vmem:[#allocation8 + $0x1a4] ss:$16 sps:$4 sm:$0xff]   ;;  %v2993_v53 = vld [vmem:[#allocation8 + $0x3a0] ss:$16 sps:$4 sm:$0xff]  }
  0x64   :  { %v2995_v51 = vld [vmem:[#allocation8 + $0x3a4] ss:$16 sps:$4 sm:$0xff]   ;;  %v2996_v56 = vld [vmem:[#allocation8 + $0x180] ss:$16 sps:$4 sm:$0xff]  }
  0x65   :  { %v2998_v54 = vld [vmem:[#allocation8 + $0x184] ss:$16 sps:$4 sm:$0xff]   ;;  %v2999_v57 = vld [vmem:[#allocation8 + $0x380] ss:$16 sps:$4 sm:$0xff]  }
  0x66   :  { %1076 = vmatpush1.bf16.msra.mxu0 %v2954_v28  ;;  %1117 = vmatpush1.bf16.msra.mxu1 %v2957_v29  ;;  %v3001_v55 = vld [vmem:[#allocation8 + $0x384] ss:$16 sps:$4 sm:$0xff]   ;;  %v3002_v60 = vld [vmem:[#allocation8 + $0x160] ss:$16 sps:$4 sm:$0xff]  }
  0x67   :  { %1077 = vmatprep.subr.bf16.mxu0 %v2962_v30  ;;  %1118 = vmatprep.subr.bf16.mxu1 %v2965_v31  ;;  %v3004_v58 = vld [vmem:[#allocation8 + $0x164] ss:$16 sps:$4 sm:$0xff]   ;;  %v3005_v61 = vld [vmem:[#allocation8 + $0x360] ss:$16 sps:$4 sm:$0xff]  }
  0x68   :  { %v3007_v59 = vld [vmem:[#allocation8 + $0x364] ss:$16 sps:$4 sm:$0xff]   ;;  %v3008_v0 = vld [vmem:[#allocation8 + $0x140] ss:$16 sps:$4 sm:$0xff]  }
  0x69   :  { %v3010_v62 = vld [vmem:[#allocation8 + $0x144] ss:$16 sps:$4 sm:$0xff]   ;;  %v3011_v1 = vld [vmem:[#allocation8 + $0x340] ss:$16 sps:$4 sm:$0xff]  }
  0x6a   :  { %1078 = vmatpush1.bf16.msra.mxu0 %v2960_v32  ;;  %1119 = vmatpush1.bf16.msra.mxu1 %v2963_v33  ;;  %v3013_v63 = vld [vmem:[#allocation8 + $0x344] ss:$16 sps:$4 sm:$0xff]   ;;  %v3014_v4 = vld [vmem:[#allocation8 + $0x120] ss:$16 sps:$4 sm:$0xff]  }
  0x6b   :  { %1079 = vmatprep.subr.bf16.mxu0 %v2968_v34  ;;  %1120 = vmatprep.subr.bf16.mxu1 %v2971_v35  ;;  %v3016_v2 = vld [vmem:[#allocation8 + $0x124] ss:$16 sps:$4 sm:$0xff]   ;;  %v3017_v5 = vld [vmem:[#allocation8 + $0x320] ss:$16 sps:$4 sm:$0xff]  }
  0x6c   :  { %v3019_v3 = vld [vmem:[#allocation8 + $0x324] ss:$16 sps:$4 sm:$0xff]   ;;  %v3020_v8 = vld [vmem:[#allocation8 + $0x100] ss:$16 sps:$4 sm:$0xff]  }
  0x6d   :  { %v3022_v6 = vld [vmem:[#allocation8 + $0x104] ss:$16 sps:$4 sm:$0xff]   ;;  %v3023_v9 = vld [vmem:[#allocation8 + $0x300] ss:$16 sps:$4 sm:$0xff]  }
  0x6e   :  { %1080 = vmatpush1.bf16.msra.mxu0 %v2966_v36  ;;  %1121 = vmatpush1.bf16.msra.mxu1 %v2969_v37  ;;  %v3025_v7 = vld [vmem:[#allocation8 + $0x304] ss:$16 sps:$4 sm:$0xff]  }
  0x6f   :  { %1081 = vmatprep.subr.bf16.mxu0 %v2974_v38  ;;  %1122 = vmatprep.subr.bf16.mxu1 %v2977_v39 }
  0x72   :  { %1082 = vmatpush1.bf16.msra.mxu0 %v2972_v40  ;;  %1123 = vmatpush1.bf16.msra.mxu1 %v2975_v41 }
  0x73   :  { %1083 = vmatprep.subr.bf16.mxu0 %v2980_v42  ;;  %1124 = vmatprep.subr.bf16.mxu1 %v2983_v43  ;;  %v3026_v42 = vld [vmem:[#allocation8 + $0xe8] ss:$16 sps:$4 sm:$0xff]  }
  0x74   :  { %v3029_v43 = vld [vmem:[#allocation8 + $0x2e8] ss:$16 sps:$4 sm:$0xff]  }
  0x76   :  { %1084 = vmatpush2.bf16.msra.mxu0 %v2978_v44  ;;  %1125 = vmatpush2.bf16.msra.mxu1 %v2981_v45  ;;  %v3034_v45 = vld [vmem:[#allocation8 + $0xcc] ss:$16 sps:$4 sm:$0xff]  }
  0x77   :  { %1085 = vmatprep.subr.bf16.mxu0 %v2986_v46  ;;  %1126 = vmatprep.subr.bf16.mxu1 %v2989_v47  ;;  %v3037_v46 = vld [vmem:[#allocation8 + $0x2cc] ss:$16 sps:$4 sm:$0xff]   ;;  %v3032_v47 = vld [vmem:[#allocation8 + $0xc8] ss:$16 sps:$4 sm:$0xff]  }
  0x7a   :  { %1086 = vmatpush2.bf16.msra.mxu0 %v2984_v48  ;;  %1127 = vmatpush2.bf16.msra.mxu1 %v2987_v49  ;;  %v3035_v48 = vld [vmem:[#allocation8 + $0x2c8] ss:$16 sps:$4 sm:$0xff]   ;;  %v3040_v49 = vld [vmem:[#allocation8 + $0xac] ss:$16 sps:$4 sm:$0xff]  }
  0x7b   :  { %1087 = vmatprep.subr.bf16.mxu0 %v2992_v50  ;;  %1128 = vmatprep.subr.bf16.mxu1 %v2995_v51  ;;  %v3043_v50 = vld [vmem:[#allocation8 + $0x2ac] ss:$16 sps:$4 sm:$0xff]   ;;  %v3038_v51 = vld [vmem:[#allocation8 + $0xa8] ss:$16 sps:$4 sm:$0xff]  }
  0x7e   :  { %1088 = vmatpush2.bf16.msra.mxu0 %v2990_v52  ;;  %1129 = vmatpush2.bf16.msra.mxu1 %v2993_v53  ;;  %v3041_v52 = vld [vmem:[#allocation8 + $0x2a8] ss:$16 sps:$4 sm:$0xff]   ;;  %v3046_v53 = vld [vmem:[#allocation8 + $0x8c] ss:$16 sps:$4 sm:$0xff]  }
  0x7f   :  { %1089 = vmatprep.subr.bf16.mxu0 %v2998_v54  ;;  %1130 = vmatprep.subr.bf16.mxu1 %v3001_v55  ;;  %v3049_v54 = vld [vmem:[#allocation8 + $0x28c] ss:$16 sps:$4 sm:$0xff]   ;;  %v3044_v55 = vld [vmem:[#allocation8 + $0x88] ss:$16 sps:$4 sm:$0xff]  }
  0x82   :  { %1090 = vmatpush2.bf16.msra.mxu0 %v2996_v56  ;;  %1131 = vmatpush2.bf16.msra.mxu1 %v2999_v57  ;;  %v3047_v56 = vld [vmem:[#allocation8 + $0x288] ss:$16 sps:$4 sm:$0xff]   ;;  %v3052_v57 = vld [vmem:[#allocation8 + $0x6c] ss:$16 sps:$4 sm:$0xff]  }
  0x83   :  { %1091 = vmatprep.subr.bf16.mxu0 %v3004_v58  ;;  %1132 = vmatprep.subr.bf16.mxu1 %v3007_v59  ;;  %v3055_v58 = vld [vmem:[#allocation8 + $0x26c] ss:$16 sps:$4 sm:$0xff]   ;;  %v3050_v59 = vld [vmem:[#allocation8 + $0x68] ss:$16 sps:$4 sm:$0xff]  }
  0x86   :  { %1092 = vmatpush2.bf16.msra.mxu0 %v3002_v60  ;;  %1133 = vmatpush2.bf16.msra.mxu1 %v3005_v61  ;;  %v3053_v60 = vld [vmem:[#allocation8 + $0x268] ss:$16 sps:$4 sm:$0xff]   ;;  %v3058_v61 = vld [vmem:[#allocation8 + $0x4c] ss:$16 sps:$4 sm:$0xff]  }
  0x87   :  { %1093 = vmatprep.subr.bf16.mxu0 %v3010_v62  ;;  %1134 = vmatprep.subr.bf16.mxu1 %v3013_v63  ;;  %v3061_v62 = vld [vmem:[#allocation8 + $0x24c] ss:$16 sps:$4 sm:$0xff]   ;;  %v3056_v63 = vld [vmem:[#allocation8 + $0x48] ss:$16 sps:$4 sm:$0xff]  }
  0x8a   :  { %1094 = vmatpush2.bf16.msra.mxu0 %v3008_v0  ;;  %1135 = vmatpush2.bf16.msra.mxu1 %v3011_v1  ;;  %v3059_v0 = vld [vmem:[#allocation8 + $0x248] ss:$16 sps:$4 sm:$0xff]   ;;  %v3064_v1 = vld [vmem:[#allocation8 + $0x2c] ss:$16 sps:$4 sm:$0xff]  }
  0x8b   :  { %1095 = vmatprep.subr.bf16.mxu0 %v3016_v2  ;;  %1136 = vmatprep.subr.bf16.mxu1 %v3019_v3  ;;  %v3067_v2 = vld [vmem:[#allocation8 + $0x22c] ss:$16 sps:$4 sm:$0xff]   ;;  %v3062_v3 = vld [vmem:[#allocation8 + $0x28] ss:$16 sps:$4 sm:$0xff]  }
  0x8e   :  { %1096 = vmatpush2.bf16.msra.mxu0 %v3014_v4  ;;  %1137 = vmatpush2.bf16.msra.mxu1 %v3017_v5  ;;  %v3065_v4 = vld [vmem:[#allocation8 + $0x228] ss:$16 sps:$4 sm:$0xff]   ;;  %v3070_v5 = vld [vmem:[#allocation8 + $0xc] ss:$16 sps:$4 sm:$0xff]  }
  0x8f   :  { %1097 = vmatprep.subr.bf16.mxu0 %v3022_v6  ;;  %1138 = vmatprep.subr.bf16.mxu1 %v3025_v7  ;;  %v3073_v6 = vld [vmem:[#allocation8 + $0x20c] ss:$16 sps:$4 sm:$0xff]   ;;  %v3068_v7 = vld [vmem:[#allocation8 + $0x8] ss:$16 sps:$4 sm:$0xff]  }
  0x92   :  { %1098 = vmatpush2.bf16.msra.mxu0 %v3020_v8  ;;  %1139 = vmatpush2.bf16.msra.mxu1 %v3023_v9  ;;  %v3071_v8 = vld [vmem:[#allocation8 + $0x208] ss:$16 sps:$4 sm:$0xff]   ;;  %v3076_v9 = vld [vmem:[#allocation8 + $0x1ec] ss:$16 sps:$4 sm:$0xff]  }
  0x93   :  { %1149 = vmatprep.subr.bf16.mxu0 %v3028_v10  ;;  %1190 = vmatprep.subr.bf16.mxu1 %v3031_v11  ;;  %v3079_v10 = vld [vmem:[#allocation8 + $0x3ec] ss:$16 sps:$4 sm:$0xff]   ;;  %v3074_v11 = vld [vmem:[#allocation8 + $0x1e8] ss:$16 sps:$4 sm:$0xff]  }
 0x115   :  { %v221_v23 = vpop.f32.mrf.mxu0  ;;  %v262_v24 = vpop.f32.mrf.mxu1 }
 0x116   :  { %v222_v25 = vadd.f32 %v221_v23, %v126_v19  ;;  %v263_v26 = vadd.f32 %v262_v24, %v134_v20  ;;  %v3080_v19 = vld [vmem:[#allocation8 + $0x1c8] ss:$16 sps:$4 sm:$0xff]  }
 0x117   :  { %v223_v27 = vpop.f32.mrf.mxu0  ;;  %v264_v28 = vpop.f32.mrf.mxu1  ;;  %v3083_v20 = vld [vmem:[#allocation8 + $0x3c8] ss:$16 sps:$4 sm:$0xff]  }
 0x118   :  { %v271_v29 = vmax.f32 %v263_v26, 0.0  ;;  %v224_v30 = vadd.f32 %v223_v27, %v130_v21  ;;  %v265_v31 = vadd.f32 %v264_v28, %v138_v22  ;;  %v269_v32 = vmax.f32 %v222_v25, 0.0  ;;  %v3088_v21 = vld [vmem:[#allocation8 + $0x1ac] ss:$16 sps:$4 sm:$0xff]   ;;  %v3086_v23 = vld [vmem:[#allocation8 + $0x1a8] ss:$16 sps:$4 sm:$0xff]  }
 0x119   :  { %v225_v33 = vpop.f32.mrf.mxu0  ;;  %v266_v34 = vpop.f32.mrf.mxu1  ;;  %v3091_v22 = vld [vmem:[#allocation8 + $0x3ac] ss:$16 sps:$4 sm:$0xff]   ;;  %v3089_v24 = vld [vmem:[#allocation8 + $0x3a8] ss:$16 sps:$4 sm:$0xff]  }
 0x11a   :  { %v270_v35 = vmax.f32 %v224_v30, 0.0  ;;  %v272_v36 = vmax.f32 %v265_v31, 0.0  ;;  %v3597_v37 = vpack.c.bf16 %v271_v29, %v271_v29  ;;  %v3599_v44 = vpack.c.bf16 %v269_v32, %v269_v32  ;;  %v3094_v25 = vld [vmem:[#allocation8 + $0x18c] ss:$16 sps:$4 sm:$0xff]   ;;  %v3092_v27 = vld [vmem:[#allocation8 + $0x188] ss:$16 sps:$4 sm:$0xff]  }
 0x11b   :  { %v226_v38 = vpop.f32.mrf.mxu0  ;;  %v267_v39 = vpop.f32.mrf.mxu1  ;;  %v3097_v26 = vld [vmem:[#allocation8 + $0x38c] ss:$16 sps:$4 sm:$0xff]   ;;  %v3095_v28 = vld [vmem:[#allocation8 + $0x388] ss:$16 sps:$4 sm:$0xff]  }
 0x11c   :  { %v274_v40 = vpack.c.bf16 %v270_v35, %v270_v35  ;;  %v276_v41 = vpack.c.bf16 %v272_v36, %v272_v36  ;;  %v3100_v29 = vld [vmem:[#allocation8 + $0x16c] ss:$16 sps:$4 sm:$0xff]   ;;  %v3098_v31 = vld [vmem:[#allocation8 + $0x168] ss:$16 sps:$4 sm:$0xff]  }
 0x11d   :  { %v3103_v30 = vld [vmem:[#allocation8 + $0x36c] ss:$16 sps:$4 sm:$0xff]   ;;  %v3101_v32 = vld [vmem:[#allocation8 + $0x368] ss:$16 sps:$4 sm:$0xff]  }
 0x11e   :  { %1099 = vmatprep.mubr.bf16.mxu0 %v274_v40  ;;  %1140 = vmatprep.mubr.bf16.mxu1 %v276_v41  ;;  %v3106_v33 = vld [vmem:[#allocation8 + $0x14c] ss:$16 sps:$4 sm:$0xff]   ;;  %v3104_v35 = vld [vmem:[#allocation8 + $0x148] ss:$16 sps:$4 sm:$0xff]  }
 0x11f   :  { %1100 = vmatmul.mubr.bf16.vlgmr.msra.gmra.mxu0 %v3599_v44  ;;  %1141 = vmatmul.mubr.bf16.vlgmr.msra.gmra.mxu1 %v3597_v37  ;;  %v3109_v34 = vld [vmem:[#allocation8 + $0x34c] ss:$16 sps:$4 sm:$0xff]   ;;  %v3107_v36 = vld [vmem:[#allocation8 + $0x348] ss:$16 sps:$4 sm:$0xff]  }
 0x120   :  { %1150 = vmatpush1.bf16.msra.mxu0 %v3026_v42  ;;  %1191 = vmatpush1.bf16.msra.mxu1 %v3029_v43  ;;  %v3112_v38 = vld [vmem:[#allocation8 + $0x12c] ss:$16 sps:$4 sm:$0xff]  }
 0x121   :  { %1181 = vmatprep.mubr.bf16.mxu0 %v274_v40  ;;  %1222 = vmatprep.mubr.bf16.mxu1 %v276_v41  ;;  %v3115_v39 = vld [vmem:[#allocation8 + $0x32c] ss:$16 sps:$4 sm:$0xff]   ;;  %v3110_v40 = vld [vmem:[#allocation8 + $0x128] ss:$16 sps:$4 sm:$0xff]  }
 0x122   :  { %1151 = vmatprep.subr.bf16.mxu0 %v3034_v45  ;;  %1192 = vmatprep.subr.bf16.mxu1 %v3037_v46  ;;  %v3113_v41 = vld [vmem:[#allocation8 + $0x328] ss:$16 sps:$4 sm:$0xff]   ;;  %v3118_v42 = vld [vmem:[#allocation8 + $0x10c] ss:$16 sps:$4 sm:$0xff]  }
 0x123   :  { %v3121_v43 = vld [vmem:[#allocation8 + $0x30c] ss:$16 sps:$4 sm:$0xff]   ;;  %v3116_v45 = vld [vmem:[#allocation8 + $0x108] ss:$16 sps:$4 sm:$0xff]  }
 0x124   :  { %1152 = vmatpush1.bf16.msra.mxu0 %v3032_v47  ;;  %1193 = vmatpush1.bf16.msra.mxu1 %v3035_v48  ;;  %v3119_v46 = vld [vmem:[#allocation8 + $0x308] ss:$16 sps:$4 sm:$0xff]   ;;  %v3124_v47 = vld [vmem:[#allocation10 + $0xe4] ss:$16 sps:$4 sm:$0xff]   ;;  %v3122_v48 = vld [vmem:[#allocation10 + $0xe0] ss:$16 sps:$4 sm:$0xff]  }
 0x125   :  { %1153 = vmatprep.subr.bf16.mxu0 %v3040_v49  ;;  %1194 = vmatprep.subr.bf16.mxu1 %v3043_v50  ;;  %v3127_v49 = vld [vmem:[#allocation10 + $0xc4] ss:$16 sps:$4 sm:$0xff]   ;;  %v3125_v50 = vld [vmem:[#allocation10 + $0xc0] ss:$16 sps:$4 sm:$0xff]  }
 0x128   :  { %1154 = vmatpush1.bf16.msra.mxu0 %v3038_v51  ;;  %1195 = vmatpush1.bf16.msra.mxu1 %v3041_v52  ;;  %v3130_v51 = vld [vmem:[#allocation10 + $0xa4] ss:$16 sps:$4 sm:$0xff]   ;;  %v3128_v52 = vld [vmem:[#allocation10 + $0xa0] ss:$16 sps:$4 sm:$0xff]  }
 0x129   :  { %1155 = vmatprep.subr.bf16.mxu0 %v3046_v53  ;;  %1196 = vmatprep.subr.bf16.mxu1 %v3049_v54  ;;  %v3133_v53 = vld [vmem:[#allocation10 + $0x84] ss:$16 sps:$4 sm:$0xff]   ;;  %v3131_v54 = vld [vmem:[#allocation10 + $0x80] ss:$16 sps:$4 sm:$0xff]  }
 0x12c   :  { %1156 = vmatpush1.bf16.msra.mxu0 %v3044_v55  ;;  %1197 = vmatpush1.bf16.msra.mxu1 %v3047_v56  ;;  %v3170_v55 = vld [vmem:[#allocation10 + $0x2e0] ss:$16 sps:$4 sm:$0xff]   ;;  %v3172_v56 = vld [vmem:[#allocation10 + $0x2e4] ss:$16 sps:$4 sm:$0xff]  }
 0x12d   :  { %1157 = vmatprep.subr.bf16.mxu0 %v3052_v57  ;;  %1198 = vmatprep.subr.bf16.mxu1 %v3055_v58  ;;  %v3136_v57 = vld [vmem:[#allocation10 + $0x64] ss:$16 sps:$4 sm:$0xff]   ;;  %v3176_v58 = vld [vmem:[#allocation10 + $0x2c0] ss:$16 sps:$4 sm:$0xff]  }
 0x130   :  { %1158 = vmatpush1.bf16.msra.mxu0 %v3050_v59  ;;  %1199 = vmatpush1.bf16.msra.mxu1 %v3053_v60  ;;  %v3139_v59 = vld [vmem:[#allocation10 + $0x44] ss:$16 sps:$4 sm:$0xff]   ;;  %v3137_v60 = vld [vmem:[#allocation10 + $0x40] ss:$16 sps:$4 sm:$0xff]  }
 0x131   :  { %1159 = vmatprep.subr.bf16.mxu0 %v3058_v61  ;;  %1200 = vmatprep.subr.bf16.mxu1 %v3061_v62  ;;  %v3182_v61 = vld [vmem:[#allocation10 + $0x2a0] ss:$16 sps:$4 sm:$0xff]   ;;  %v3184_v62 = vld [vmem:[#allocation10 + $0x2a4] ss:$16 sps:$4 sm:$0xff]  }
 0x134   :  { %1160 = vmatpush1.bf16.msra.mxu0 %v3056_v63  ;;  %1201 = vmatpush1.bf16.msra.mxu1 %v3059_v0  ;;  %v3142_v63 = vld [vmem:[#allocation10 + $0x24] ss:$16 sps:$4 sm:$0xff]   ;;  %v3140_v0 = vld [vmem:[#allocation10 + $0x20] ss:$16 sps:$4 sm:$0xff]  }
 0x135   :  { %1161 = vmatprep.subr.bf16.mxu0 %v3064_v1  ;;  %1202 = vmatprep.subr.bf16.mxu1 %v3067_v2  ;;  %v3188_v1 = vld [vmem:[#allocation10 + $0x280] ss:$16 sps:$4 sm:$0xff]   ;;  %v3190_v2 = vld [vmem:[#allocation10 + $0x284] ss:$16 sps:$4 sm:$0xff]  }
 0x138   :  { %1162 = vmatpush1.bf16.msra.mxu0 %v3062_v3  ;;  %1203 = vmatpush1.bf16.msra.mxu1 %v3065_v4  ;;  %v3145_v3 = vld [vmem:[#allocation10 + $0x4] ss:$16 sps:$4 sm:$0xff]   ;;  %v3143_v4 = vld [vmem:[#allocation10] ss:$16 sps:$4 sm:$0xff]  }
 0x139   :  { %1163 = vmatprep.subr.bf16.mxu0 %v3070_v5  ;;  %1204 = vmatprep.subr.bf16.mxu1 %v3073_v6  ;;  %v3194_v5 = vld [vmem:[#allocation10 + $0x260] ss:$16 sps:$4 sm:$0xff]   ;;  %v3196_v6 = vld [vmem:[#allocation10 + $0x264] ss:$16 sps:$4 sm:$0xff]  }
 0x13c   :  { %1164 = vmatpush1.bf16.msra.mxu0 %v3068_v7  ;;  %1205 = vmatpush1.bf16.msra.mxu1 %v3071_v8  ;;  %v3148_v7 = vld [vmem:[#allocation10 + $0x1e4] ss:$16 sps:$4 sm:$0xff]   ;;  %v3146_v8 = vld [vmem:[#allocation10 + $0x1e0] ss:$16 sps:$4 sm:$0xff]  }
 0x13d   :  { %1165 = vmatprep.subr.bf16.mxu0 %v3076_v9  ;;  %1206 = vmatprep.subr.bf16.mxu1 %v3079_v10  ;;  %v3200_v9 = vld [vmem:[#allocation10 + $0x240] ss:$16 sps:$4 sm:$0xff]   ;;  %v3202_v10 = vld [vmem:[#allocation10 + $0x244] ss:$16 sps:$4 sm:$0xff]  }
 0x140   :  { %1166 = vmatpush2.bf16.msra.mxu0 %v3074_v11  ;;  %1207 = vmatpush2.bf16.msra.mxu1 %v3077_v12  ;;  %v3151_v11 = vld [vmem:[#allocation10 + $0x1c4] ss:$16 sps:$4 sm:$0xff]   ;;  %v3149_v12 = vld [vmem:[#allocation10 + $0x1c0] ss:$16 sps:$4 sm:$0xff]  }
 0x141   :  { %1167 = vmatprep.subr.bf16.mxu0 %v3082_v13  ;;  %1208 = vmatprep.subr.bf16.mxu1 %v3085_v16  ;;  %v3206_v13 = vld [vmem:[#allocation10 + $0x220] ss:$16 sps:$4 sm:$0xff]   ;;  %v3208_v16 = vld [vmem:[#allocation10 + $0x224] ss:$16 sps:$4 sm:$0xff]  }
 0x144   :  { %1168 = vmatpush2.bf16.msra.mxu0 %v3080_v19  ;;  %1209 = vmatpush2.bf16.msra.mxu1 %v3083_v20  ;;  %v3154_v19 = vld [vmem:[#allocation10 + $0x1a4] ss:$16 sps:$4 sm:$0xff]   ;;  %v3152_v20 = vld [vmem:[#allocation10 + $0x1a0] ss:$16 sps:$4 sm:$0xff]  }
 0x145   :  { %1169 = vmatprep.subr.bf16.mxu0 %v3088_v21  ;;  %1210 = vmatprep.subr.bf16.mxu1 %v3091_v22  ;;  %v3212_v21 = vld [vmem:[#allocation10 + $0x200] ss:$16 sps:$4 sm:$0xff]   ;;  %v3214_v22 = vld [vmem:[#allocation10 + $0x204] ss:$16 sps:$4 sm:$0xff]  }
 0x148   :  { %1170 = vmatpush2.bf16.msra.mxu0 %v3086_v23  ;;  %1211 = vmatpush2.bf16.msra.mxu1 %v3089_v24  ;;  %v3157_v23 = vld [vmem:[#allocation10 + $0x184] ss:$16 sps:$4 sm:$0xff]   ;;  %v3155_v24 = vld [vmem:[#allocation10 + $0x180] ss:$16 sps:$4 sm:$0xff]  }
 0x149   :  { %1171 = vmatprep.subr.bf16.mxu0 %v3094_v25  ;;  %1212 = vmatprep.subr.bf16.mxu1 %v3097_v26  ;;  %v3218_v25 = vld [vmem:[#allocation10 + $0x3e0] ss:$16 sps:$4 sm:$0xff]   ;;  %v3220_v26 = vld [vmem:[#allocation10 + $0x3e4] ss:$16 sps:$4 sm:$0xff]  }
 0x14c   :  { %1172 = vmatpush2.bf16.msra.mxu0 %v3092_v27  ;;  %1213 = vmatpush2.bf16.msra.mxu1 %v3095_v28  ;;  %v3160_v27 = vld [vmem:[#allocation10 + $0x164] ss:$16 sps:$4 sm:$0xff]   ;;  %v3158_v28 = vld [vmem:[#allocation10 + $0x160] ss:$16 sps:$4 sm:$0xff]  }
 0x14d   :  { %1173 = vmatprep.subr.bf16.mxu0 %v3100_v29  ;;  %1214 = vmatprep.subr.bf16.mxu1 %v3103_v30  ;;  %v3224_v29 = vld [vmem:[#allocation10 + $0x3c0] ss:$16 sps:$4 sm:$0xff]   ;;  %v3226_v30 = vld [vmem:[#allocation10 + $0x3c4] ss:$16 sps:$4 sm:$0xff]  }
 0x150   :  { %1174 = vmatpush2.bf16.msra.mxu0 %v3098_v31  ;;  %1215 = vmatpush2.bf16.msra.mxu1 %v3101_v32  ;;  %v3163_v31 = vld [vmem:[#allocation10 + $0x144] ss:$16 sps:$4 sm:$0xff]   ;;  %v3161_v32 = vld [vmem:[#allocation10 + $0x140] ss:$16 sps:$4 sm:$0xff]  }
 0x151   :  { %1175 = vmatprep.subr.bf16.mxu0 %v3106_v33  ;;  %1216 = vmatprep.subr.bf16.mxu1 %v3109_v34  ;;  %v3230_v33 = vld [vmem:[#allocation10 + $0x3a0] ss:$16 sps:$4 sm:$0xff]   ;;  %v3232_v34 = vld [vmem:[#allocation10 + $0x3a4] ss:$16 sps:$4 sm:$0xff]  }
 0x154   :  { %1176 = vmatpush2.bf16.msra.mxu0 %v3104_v35  ;;  %1217 = vmatpush2.bf16.msra.mxu1 %v3107_v36  ;;  %v3166_v35 = vld [vmem:[#allocation10 + $0x124] ss:$16 sps:$4 sm:$0xff]   ;;  %v3164_v36 = vld [vmem:[#allocation10 + $0x120] ss:$16 sps:$4 sm:$0xff]  }
 0x155   :  { %1177 = vmatprep.subr.bf16.mxu0 %v3112_v38  ;;  %1218 = vmatprep.subr.bf16.mxu1 %v3115_v39  ;;  %v3236_v38 = vld [vmem:[#allocation10 + $0x380] ss:$16 sps:$4 sm:$0xff]   ;;  %v3238_v39 = vld [vmem:[#allocation10 + $0x384] ss:$16 sps:$4 sm:$0xff]  }
 0x158   :  { %1178 = vmatpush2.bf16.msra.mxu0 %v3110_v40  ;;  %1219 = vmatpush2.bf16.msra.mxu1 %v3113_v41  ;;  %v3169_v40 = vld [vmem:[#allocation10 + $0x104] ss:$16 sps:$4 sm:$0xff]   ;;  %v3167_v41 = vld [vmem:[#allocation10 + $0x100] ss:$16 sps:$4 sm:$0xff]  }
 0x159   :  { %1179 = vmatprep.subr.bf16.mxu0 %v3118_v42  ;;  %1220 = vmatprep.subr.bf16.mxu1 %v3121_v43  ;;  %v3242_v42 = vld [vmem:[#allocation10 + $0x360] ss:$16 sps:$4 sm:$0xff]   ;;  %v3244_v43 = vld [vmem:[#allocation10 + $0x364] ss:$16 sps:$4 sm:$0xff]  }
 0x15c   :  { %1180 = vmatpush2.bf16.msra.mxu0 %v3116_v45  ;;  %1221 = vmatpush2.bf16.msra.mxu1 %v3119_v46  ;;  %v3175_v45 = vld [vmem:[#allocation10 + $0xec] ss:$16 sps:$4 sm:$0xff]   ;;  %v3248_v46 = vld [vmem:[#allocation10 + $0x340] ss:$16 sps:$4 sm:$0xff]  }
 0x15d   :  { %2029 = vmatprep.subr.bf16.mxu0 %v3124_v47  ;;  %2070 = vmatprep.subr.bf16.mxu1 %v3172_v56  ;;  %v3250_v47 = vld [vmem:[#allocation10 + $0x344] ss:$16 sps:$4 sm:$0xff]  }
 0x15f   :  { %1182 = vmatmul.mubr.bf16.vlgmr.msra.gmra.mxu0 %v3599_v44  ;;  %1223 = vmatmul.mubr.bf16.vlgmr.msra.gmra.mxu1 %v3597_v37  ;;  %v3134_v44 = vld [vmem:[#allocation10 + $0x60] ss:$16 sps:$4 sm:$0xff]   ;;  %v3178_v37 = vld [vmem:[#allocation10 + $0x2c4] ss:$16 sps:$4 sm:$0xff]  }
 0x160   :  { %2030 = vmatpush1.bf16.msra.mxu0 %v3122_v48  ;;  %2071 = vmatpush1.bf16.msra.mxu1 %v3170_v55  ;;  %v3256_v48 = vld [vmem:[#allocation10 + $0x324] ss:$16 sps:$4 sm:$0xff]  }
 0x161   :  { %2031 = vmatprep.subr.bf16.mxu0 %v3127_v49  ;;  %2072 = vmatprep.subr.bf16.mxu1 %v3178_v37  ;;  %v3254_v49 = vld [vmem:[#allocation10 + $0x320] ss:$16 sps:$4 sm:$0xff]  }
 0x164   :  { %2032 = vmatpush1.bf16.msra.mxu0 %v3125_v50  ;;  %2073 = vmatpush1.bf16.msra.mxu1 %v3176_v58  ;;  %v3262_v50 = vld [vmem:[#allocation10 + $0x304] ss:$16 sps:$4 sm:$0xff]  }
 0x165   :  { %2033 = vmatprep.subr.bf16.mxu0 %v3130_v51  ;;  %2074 = vmatprep.subr.bf16.mxu1 %v3184_v62  ;;  %v3260_v51 = vld [vmem:[#allocation10 + $0x300] ss:$16 sps:$4 sm:$0xff]  }
 0x168   :  { %2034 = vmatpush1.bf16.msra.mxu0 %v3128_v52  ;;  %2075 = vmatpush1.bf16.msra.mxu1 %v3182_v61  ;;  %v3268_v52 = vld [vmem:[#allocation10 + $0x2ec] ss:$16 sps:$4 sm:$0xff]  }
 0x169   :  { %2035 = vmatprep.subr.bf16.mxu0 %v3133_v53  ;;  %2076 = vmatprep.subr.bf16.mxu1 %v3190_v2  ;;  %v3608_v53 = vld [vmem:[%s3643_s4] sm:$0xf] }
 0x16a   :  { %v414_v55 = vrot.slane %v3608_v53, %v3589_v17 }
 0x16c   :  { %2036 = vmatpush1.bf16.msra.mxu0 %v3131_v54  ;;  %2077 = vmatpush1.bf16.msra.mxu1 %v3188_v1  ;;  %v410_v54 = vrot.slane %v3608_v53, %v3585_v14 }
 0x16d   :  { %2037 = vmatprep.subr.bf16.mxu0 %v3136_v57  ;;  %2078 = vmatprep.subr.bf16.mxu1 %v3196_v6 }
 0x170   :  { %2038 = vmatpush1.bf16.msra.mxu0 %v3134_v44  ;;  %2079 = vmatpush1.bf16.msra.mxu1 %v3194_v5  ;;  %v3173_v5 = vld [vmem:[#allocation10 + $0xe8] ss:$16 sps:$4 sm:$0xff]  }
 0x171   :  { %2039 = vmatprep.subr.bf16.mxu0 %v3139_v59  ;;  %2080 = vmatprep.subr.bf16.mxu1 %v3202_v10  ;;  %v3185_v10 = vld [vmem:[#allocation10 + $0xa8] ss:$16 sps:$4 sm:$0xff]  }
 0x174   :  { %2040 = vmatpush1.bf16.msra.mxu0 %v3137_v60  ;;  %2081 = vmatpush1.bf16.msra.mxu1 %v3200_v9  ;;  %v3187_v9 = vld [vmem:[#allocation10 + $0xac] ss:$16 sps:$4 sm:$0xff]  }
 0x175   :  { %2041 = vmatprep.subr.bf16.mxu0 %v3142_v63  ;;  %2082 = vmatprep.subr.bf16.mxu1 %v3208_v16  ;;  %v3197_v16 = vld [vmem:[#allocation10 + $0x68] ss:$16 sps:$4 sm:$0xff]  }
 0x178   :  { %2042 = vmatpush1.bf16.msra.mxu0 %v3140_v0  ;;  %2083 = vmatpush1.bf16.msra.mxu1 %v3206_v13  ;;  %v3199_v13 = vld [vmem:[#allocation10 + $0x6c] ss:$16 sps:$4 sm:$0xff]  }
 0x179   :  { %2043 = vmatprep.subr.bf16.mxu0 %v3145_v3  ;;  %2084 = vmatprep.subr.bf16.mxu1 %v3214_v22  ;;  %v3209_v22 = vld [vmem:[#allocation10 + $0x28] ss:$16 sps:$4 sm:$0xff]  }
 0x17c   :  { %2044 = vmatpush1.bf16.msra.mxu0 %v3143_v4  ;;  %2085 = vmatpush1.bf16.msra.mxu1 %v3212_v21  ;;  %v3211_v21 = vld [vmem:[#allocation10 + $0x2c] ss:$16 sps:$4 sm:$0xff]  }
 0x17d   :  { %2045 = vmatprep.subr.bf16.mxu0 %v3148_v7  ;;  %2086 = vmatprep.subr.bf16.mxu1 %v3220_v26  ;;  %v3181_v7 = vld [vmem:[#allocation10 + $0xcc] ss:$16 sps:$4 sm:$0xff]   ;;  %v3221_v26 = vld [vmem:[#allocation10 + $0x1e8] ss:$16 sps:$4 sm:$0xff]  }
 0x180   :  { %2046 = vmatpush2.bf16.msra.mxu0 %v3146_v8  ;;  %2087 = vmatpush2.bf16.msra.mxu1 %v3218_v25  ;;  %v3179_v8 = vld [vmem:[#allocation10 + $0xc8] ss:$16 sps:$4 sm:$0xff]   ;;  %v3223_v25 = vld [vmem:[#allocation10 + $0x1ec] ss:$16 sps:$4 sm:$0xff]  }
 0x181   :  { %2047 = vmatprep.subr.bf16.mxu0 %v3151_v11  ;;  %2088 = vmatprep.subr.bf16.mxu1 %v3226_v30  ;;  %v3193_v11 = vld [vmem:[#allocation10 + $0x8c] ss:$16 sps:$4 sm:$0xff]   ;;  %v3233_v30 = vld [vmem:[#allocation10 + $0x1a8] ss:$16 sps:$4 sm:$0xff]  }
 0x184   :  { %2048 = vmatpush2.bf16.msra.mxu0 %v3149_v12  ;;  %2089 = vmatpush2.bf16.msra.mxu1 %v3224_v29  ;;  %v3191_v12 = vld [vmem:[#allocation10 + $0x88] ss:$16 sps:$4 sm:$0xff]   ;;  %v3235_v29 = vld [vmem:[#allocation10 + $0x1ac] ss:$16 sps:$4 sm:$0xff]  }
 0x185   :  { %2049 = vmatprep.subr.bf16.mxu0 %v3154_v19  ;;  %2090 = vmatprep.subr.bf16.mxu1 %v3232_v34  ;;  %v3205_v19 = vld [vmem:[#allocation10 + $0x4c] ss:$16 sps:$4 sm:$0xff]   ;;  %v3245_v34 = vld [vmem:[#allocation10 + $0x168] ss:$16 sps:$4 sm:$0xff]  }
 0x188   :  { %2050 = vmatpush2.bf16.msra.mxu0 %v3152_v20  ;;  %2091 = vmatpush2.bf16.msra.mxu1 %v3230_v33  ;;  %v3203_v20 = vld [vmem:[#allocation10 + $0x48] ss:$16 sps:$4 sm:$0xff]   ;;  %v3247_v33 = vld [vmem:[#allocation10 + $0x16c] ss:$16 sps:$4 sm:$0xff]  }
 0x189   :  { %2051 = vmatprep.subr.bf16.mxu0 %v3157_v23  ;;  %2092 = vmatprep.subr.bf16.mxu1 %v3238_v39  ;;  %v3217_v23 = vld [vmem:[#allocation10 + $0xc] ss:$16 sps:$4 sm:$0xff]  }
 0x18a   :  { %v3259_v39 = vld [vmem:[#allocation10 + $0x12c] ss:$16 sps:$4 sm:$0xff]  }
 0x18c   :  { %2052 = vmatpush2.bf16.msra.mxu0 %v3155_v24  ;;  %2093 = vmatpush2.bf16.msra.mxu1 %v3236_v38  ;;  %v3215_v24 = vld [vmem:[#allocation10 + $0x8] ss:$16 sps:$4 sm:$0xff]  }
 0x18d   :  { %2053 = vmatprep.subr.bf16.mxu0 %v3160_v27  ;;  %2094 = vmatprep.subr.bf16.mxu1 %v3244_v43  ;;  %v3229_v27 = vld [vmem:[#allocation10 + $0x1cc] ss:$16 sps:$4 sm:$0xff]   ;;  %v3251_v38 = vld [vmem:[#allocation10 + $0x148] ss:$16 sps:$4 sm:$0xff]  }
 0x190   :  { %2054 = vmatpush2.bf16.msra.mxu0 %v3158_v28  ;;  %2095 = vmatpush2.bf16.msra.mxu1 %v3242_v42  ;;  %v3227_v28 = vld [vmem:[#allocation10 + $0x1c8] ss:$16 sps:$4 sm:$0xff]  }
 0x191   :  { %2055 = vmatprep.subr.bf16.mxu0 %v3163_v31  ;;  %2096 = vmatprep.subr.bf16.mxu1 %v3250_v47  ;;  %v3241_v31 = vld [vmem:[#allocation10 + $0x18c] ss:$16 sps:$4 sm:$0xff]  }
 0x194   :  { %2056 = vmatpush2.bf16.msra.mxu0 %v3161_v32  ;;  %2097 = vmatpush2.bf16.msra.mxu1 %v3248_v46  ;;  %v3239_v32 = vld [vmem:[#allocation10 + $0x188] ss:$16 sps:$4 sm:$0xff]  }
 0x195   :  { %2057 = vmatprep.subr.bf16.mxu0 %v3166_v35  ;;  %2098 = vmatprep.subr.bf16.mxu1 %v3256_v48  ;;  %v3253_v35 = vld [vmem:[#allocation10 + $0x14c] ss:$16 sps:$4 sm:$0xff]  }
 0x196   :  { %v3265_v48 = vld [vmem:[#allocation10 + $0x10c] ss:$16 sps:$4 sm:$0xff]  }
 0x198   :  { %2058 = vmatpush2.bf16.msra.mxu0 %v3164_v36  ;;  %2099 = vmatpush2.bf16.msra.mxu1 %v3254_v49  ;;  %v418_v36 = vrot.slane %v3608_v53, %v3587_v15 }
 0x199   :  { %2059 = vmatprep.subr.bf16.mxu0 %v3169_v40  ;;  %2100 = vmatprep.subr.bf16.mxu1 %v3262_v50  ;;  %v422_v40 = vrot.slane %v3608_v53, %v3591_v18 }
 0x19c   :  { %2060 = vmatpush2.bf16.msra.mxu0 %v3167_v41  ;;  %2101 = vmatpush2.bf16.msra.mxu1 %v3260_v51 }
 0x19d   :  { %2111 = vmatprep.subr.bf16.mxu0 %v3175_v45  ;;  %2152 = vmatprep.subr.bf16.mxu1 %v3268_v52  ;;  %v3257_v45 = vld [vmem:[#allocation10 + $0x128] ss:$16 sps:$4 sm:$0xff]  }
 0x1df   :  { %v1101_v56 = vpop.f32.mrf.mxu0  ;;  %v1142_v57 = vpop.f32.mrf.mxu1 }
 0x1e0   :  { %v1102_v44 = vadd.f32 %v1101_v56, %v410_v54 }
 0x1e1   :  { %v1103_v58 = vpop.f32.mrf.mxu0  ;;  %v1144_v37 = vpop.f32.mrf.mxu1 }
 0x1e2   :  { %v1143_v59 = vadd.f32 %v1142_v57, %v1102_v44  ;;  %v1104_v60 = vadd.f32 %v1103_v58, %v414_v55  ;;  %v3263_v55 = vld [vmem:[#allocation10 + $0x108] ss:$16 sps:$4 sm:$0xff]  }
 0x1e3   :  { %v1105_v61 = vpop.f32.mrf.mxu0  ;;  %v1146_v62 = vpop.f32.mrf.mxu1 }
 0x1e4   :  { %v1145_v63 = vadd.f32 %v1144_v37, %v1104_v60  ;;  %v1231_v0 = vmax.f32 %v1143_v59, 0.0  ;;  %v3266_v37 = vld [vmem:[#allocation10 + $0x2e8] ss:$16 sps:$4 sm:$0xff]   ;;  %v3271_v60 = vld [vmem:[#allocation10 + $0x2cc] ss:$16 sps:$4 sm:$0xff]  }
 0x1e5   :  { %v1106_v1 = vpop.f32.mrf.mxu0  ;;  %v1147_v2 = vpop.f32.mrf.mxu1  ;;  %v3269_v61 = vld [vmem:[#allocation10 + $0x2c8] ss:$16 sps:$4 sm:$0xff]   ;;  %v3274_v62 = vld [vmem:[#allocation10 + $0x2ac] ss:$16 sps:$4 sm:$0xff]  }
 0x1e6   :  { %v1232_v3 = vmax.f32 %v1145_v63, 0.0  ;;  %v3614_v6 = vpack.c.bf16 %v1231_v0, %v1231_v0  ;;  %v3272_v63 = vld [vmem:[#allocation10 + $0x2a8] ss:$16 sps:$4 sm:$0xff]   ;;  %v3277_v0 = vld [vmem:[#allocation10 + $0x28c] ss:$16 sps:$4 sm:$0xff]  }
 0x1e7   :  { %v3314_v1 = vld [vmem:[#allocation11 + $0x78] sm:$0xff]  }
 0x1e8   :  { %v1236_v4 = vpack.c.bf16 %v1232_v3, %v1232_v3  ;;  %v3315_v2 = vld [vmem:[#allocation11 + $0x38] sm:$0xff]   ;;  %v3316_v3 = vld [vmem:[#allocation11 + $0x70] sm:$0xff]  }
 0x1ea   :  { %2061 = vmatprep.mubr.bf16.mxu0 %v1236_v4 }
 0x1eb   :  { %2062 = vmatmul.mubr.bf16.vlgmr.msra.gmra.mxu0 %v3614_v6 }
 0x1ec   :  { %2112 = vmatpush1.bf16.msra.mxu0 %v3173_v5  ;;  %2143 = vmatprep.mubr.bf16.mxu0 %v1236_v4  ;;  %v3275_v4 = vld [vmem:[#allocation10 + $0x288] ss:$16 sps:$4 sm:$0xff]   ;;  %v3317_v5 = vld [vmem:[#allocation11 + $0x30] sm:$0xff]  }
 0x1ed   :  { %2113 = vmatprep.subr.bf16.mxu0 %v3181_v7  ;;  %v3280_v7 = vld [vmem:[#allocation10 + $0x26c] ss:$16 sps:$4 sm:$0xff]  }
 0x1f0   :  { %2114 = vmatpush1.bf16.msra.mxu0 %v3179_v8  ;;  %v3278_v8 = vld [vmem:[#allocation10 + $0x268] ss:$16 sps:$4 sm:$0xff]  }
 0x1f1   :  { %2115 = vmatprep.subr.bf16.mxu0 %v3187_v9  ;;  %v3319_v9 = vld [vmem:[#allocation11 + $0x28] sm:$0xff]  }
 0x1f4   :  { %2116 = vmatpush1.bf16.msra.mxu0 %v3185_v10  ;;  %v3283_v10 = vld [vmem:[#allocation10 + $0x24c] ss:$16 sps:$4 sm:$0xff]  }
 0x1f5   :  { %2117 = vmatprep.subr.bf16.mxu0 %v3193_v11  ;;  %v3320_v11 = vld [vmem:[#allocation11 + $0x60] sm:$0xff]  }
 0x1f8   :  { %2118 = vmatpush1.bf16.msra.mxu0 %v3191_v12  ;;  %v3281_v12 = vld [vmem:[#allocation10 + $0x248] ss:$16 sps:$4 sm:$0xff]  }
 0x1f9   :  { %2119 = vmatprep.subr.bf16.mxu0 %v3199_v13  ;;  %v3321_v13 = vld [vmem:[#allocation11 + $0x20] sm:$0xff]  }
 0x1fc   :  { %2120 = vmatpush1.bf16.msra.mxu0 %v3197_v16  ;;  %v3286_v16 = vld [vmem:[#allocation10 + $0x22c] ss:$16 sps:$4 sm:$0xff]  }
 0x1fd   :  { %2121 = vmatprep.subr.bf16.mxu0 %v3205_v19  ;;  %v3322_v19 = vld [vmem:[#allocation11 + $0x58] sm:$0xff]  }
 0x200   :  { %2122 = vmatpush1.bf16.msra.mxu0 %v3203_v20  ;;  %v3284_v20 = vld [vmem:[#allocation10 + $0x228] ss:$16 sps:$4 sm:$0xff]  }
 0x201   :  { %2123 = vmatprep.subr.bf16.mxu0 %v3211_v21  ;;  %v3323_v21 = vld [vmem:[#allocation11 + $0x18] sm:$0xff]  }
 0x204   :  { %2124 = vmatpush1.bf16.msra.mxu0 %v3209_v22  ;;  %v3289_v22 = vld [vmem:[#allocation10 + $0x20c] ss:$16 sps:$4 sm:$0xff]  }
 0x205   :  { %2125 = vmatprep.subr.bf16.mxu0 %v3217_v23  ;;  %v3324_v23 = vld [vmem:[#allocation11 + $0x50] sm:$0xff]  }
 0x208   :  { %2126 = vmatpush1.bf16.msra.mxu0 %v3215_v24  ;;  %v3287_v24 = vld [vmem:[#allocation10 + $0x208] ss:$16 sps:$4 sm:$0xff]  }
 0x209   :  { %2127 = vmatprep.subr.bf16.mxu0 %v3223_v25  ;;  %v3325_v25 = vld [vmem:[#allocation11 + $0x10] sm:$0xff]  }
 0x20c   :  { %2128 = vmatpush2.bf16.msra.mxu0 %v3221_v26  ;;  %v3292_v26 = vld [vmem:[#allocation10 + $0x3ec] ss:$16 sps:$4 sm:$0xff]  }
 0x20d   :  { %2129 = vmatprep.subr.bf16.mxu0 %v3229_v27  ;;  %v3290_v27 = vld [vmem:[#allocation10 + $0x3e8] ss:$16 sps:$4 sm:$0xff]  }
 0x210   :  { %2130 = vmatpush2.bf16.msra.mxu0 %v3227_v28  ;;  %v3295_v28 = vld [vmem:[#allocation10 + $0x3cc] ss:$16 sps:$4 sm:$0xff]  }
 0x211   :  { %2131 = vmatprep.subr.bf16.mxu0 %v3235_v29  ;;  %v3293_v29 = vld [vmem:[#allocation10 + $0x3c8] ss:$16 sps:$4 sm:$0xff]  }
 0x214   :  { %2132 = vmatpush2.bf16.msra.mxu0 %v3233_v30  ;;  %v3298_v30 = vld [vmem:[#allocation10 + $0x3ac] ss:$16 sps:$4 sm:$0xff]  }
 0x215   :  { %2133 = vmatprep.subr.bf16.mxu0 %v3241_v31  ;;  %v3296_v31 = vld [vmem:[#allocation10 + $0x3a8] ss:$16 sps:$4 sm:$0xff]  }
 0x218   :  { %2134 = vmatpush2.bf16.msra.mxu0 %v3239_v32  ;;  %v3301_v32 = vld [vmem:[#allocation10 + $0x38c] ss:$16 sps:$4 sm:$0xff]  }
 0x219   :  { %2135 = vmatprep.subr.bf16.mxu0 %v3247_v33  ;;  %v3299_v33 = vld [vmem:[#allocation10 + $0x388] ss:$16 sps:$4 sm:$0xff]  }
 0x21c   :  { %2136 = vmatpush2.bf16.msra.mxu0 %v3245_v34  ;;  %v3304_v34 = vld [vmem:[#allocation10 + $0x36c] ss:$16 sps:$4 sm:$0xff]  }
 0x21d   :  { %2137 = vmatprep.subr.bf16.mxu0 %v3253_v35  ;;  %v3302_v35 = vld [vmem:[#allocation10 + $0x368] ss:$16 sps:$4 sm:$0xff]  }
 0x21f   :  { %v1183_v41 = vpop.f32.mrf.mxu0  ;;  %v1224_v42 = vpop.f32.mrf.mxu1 }
 0x220   :  { %v1184_v43 = vadd.f32 %v1183_v41, %v418_v36  ;;  %2138 = vmatpush2.bf16.msra.mxu0 %v3251_v38  ;;  %v3307_v36 = vld [vmem:[#allocation10 + $0x34c] ss:$16 sps:$4 sm:$0xff]   ;;  %v3305_v38 = vld [vmem:[#allocation10 + $0x348] ss:$16 sps:$4 sm:$0xff]  }
 0x221   :  { %v1185_v46 = vpop.f32.mrf.mxu0  ;;  %v1226_v47 = vpop.f32.mrf.mxu1  ;;  %2139 = vmatprep.subr.bf16.mxu0 %v3259_v39  ;;  %v3310_v39 = vld [vmem:[#allocation10 + $0x32c] ss:$16 sps:$4 sm:$0xff]  }
 0x222   :  { %v1225_v49 = vadd.f32 %v1224_v42, %v1184_v43  ;;  %v1186_v50 = vadd.f32 %v1185_v46, %v422_v40  ;;  %v3308_v40 = vld [vmem:[#allocation10 + $0x328] ss:$16 sps:$4 sm:$0xff]   ;;  %v3313_v41 = vld [vmem:[#allocation10 + $0x30c] ss:$16 sps:$4 sm:$0xff]   ;;  %v3328_v46 = vld [vmem:[#allocation11 + $0x40] sm:$0xff]  }
 0x223   :  { %v1187_v51 = vpop.f32.mrf.mxu0  ;;  %v1228_v52 = vpop.f32.mrf.mxu1  ;;  %v3311_v42 = vld [vmem:[#allocation10 + $0x308] ss:$16 sps:$4 sm:$0xff]  }
 0x224   :  { %v1227_v54 = vadd.f32 %v1226_v47, %v1186_v50  ;;  %2140 = vmatpush2.bf16.msra.mxu0 %v3257_v45  ;;  %v1233_v56 = vmax.f32 %v1225_v49, 0.0  ;;  %v3326_v43 = vld [vmem:[#allocation11 + $0x48] sm:$0xff]   ;;  %v3329_v47 = vld [vmem:[#allocation11] sm:$0xff]   ;;  %v3331_v49 = vld [vmem:[#allocation11 + $0xb8] sm:$0xff]  }
 0x225   :  { %v1188_v57 = vpop.f32.mrf.mxu0  ;;  %v1229_v44 = vpop.f32.mrf.mxu1  ;;  %2141 = vmatprep.subr.bf16.mxu0 %v3265_v48  ;;  %v3327_v45 = vld [vmem:[#allocation11 + $0x8] sm:$0xff]   ;;  %v3330_v48 = vld [vmem:[#allocation11 + $0xf8] sm:$0xff]   ;;  %v3332_v50 = vld [vmem:[#allocation11 + $0xf0] sm:$0xff]  }
 0x226   :  { %v1234_v53 = vmax.f32 %v1227_v54, 0.0  ;;  %v3621_v59 = vpack.c.bf16 %v1233_v56, %v1233_v56  ;;  %v3333_v51 = vld [vmem:[#allocation11 + $0xb0] sm:$0xff]   ;;  %v3334_v52 = vld [vmem:[#allocation11 + $0xe8] sm:$0xff]   ;;  %v3337_v56 = vld [vmem:[#allocation11 + $0xa0] sm:$0xff]  }
 0x227   :  { %v3335_v54 = vld [vmem:[#allocation11 + $0xa8] sm:$0xff]   ;;  %v3338_v57 = vld [vmem:[#allocation11 + $0xd8] sm:$0xff]  }
 0x228   :  { %v1238_v58 = vpack.c.bf16 %v1234_v53, %v1234_v53  ;;  %2142 = vmatpush2.bf16.msra.mxu0 %v3263_v55  ;;  %v3336_v55 = vld [vmem:[#allocation11 + $0xe0] sm:$0xff]   ;;  %v3339_v44 = vld [vmem:[#allocation11 + $0x98] sm:$0xff]   ;;  %v3340_v53 = vld [vmem:[#allocation11 + $0xd0] sm:$0xff]  }
 0x229   :  { %2862 = vmatprep.subr.bf16.mxu0 %v3314_v1 }
 0x22a   :  { %2102 = vmatprep.mubr.bf16.mxu1 %v1238_v58 }
 0x22b   :  { %2103 = vmatmul.mubr.bf16.vlgmr.msra.gmra.mxu1 %v3621_v59  ;;  %2144 = vmatmul.mubr.bf16.vlgmr.msra.gmra.mxu0 %v3614_v6  ;;  %v3318_v6 = vld [vmem:[#allocation11 + $0x68] sm:$0xff]  }
 0x22c   :  { %2153 = vmatpush1.bf16.msra.mxu1 %v3266_v37  ;;  %2184 = vmatprep.mubr.bf16.mxu1 %v1238_v58  ;;  %v3341_v58 = vld [vmem:[#allocation11 + $0x90] sm:$0xff]  }
 0x22d   :  { %2154 = vmatprep.subr.bf16.mxu1 %v3271_v60  ;;  %2863 = vmatpush3.bf16.msra.mxu0 %v3315_v2  ;;  %v3343_v60 = vld [vmem:[#allocation11 + $0x88] sm:$0xff]   ;;  %v1367_v2 = vld [vmem:[%s3645_s6] sm:$0xf] }
 0x22e   :  { %2864 = vmatprep.subr.bf16.mxu0 %v3316_v3  ;;  %v1372_v3 = vrot.slane %v1367_v2, %v3585_v14  ;;  %v1380_v14 = vrot.slane %v1367_v2, %v3587_v15 }
 0x230   :  { %2155 = vmatpush1.bf16.msra.mxu1 %v3269_v61 }
 0x231   :  { %2156 = vmatprep.subr.bf16.mxu1 %v3274_v62  ;;  %2865 = vmatpush3.bf16.msra.mxu0 %v3317_v5 }
 0x232   :  { %2866 = vmatprep.subr.bf16.mxu0 %v3318_v6 }
 0x234   :  { %2157 = vmatpush1.bf16.msra.mxu1 %v3272_v63  ;;  %v3344_v63 = vld [vmem:[#allocation11 + $0xc0] sm:$0xff]  }
 0x235   :  { %2158 = vmatprep.subr.bf16.mxu1 %v3277_v0  ;;  %2867 = vmatpush3.bf16.msra.mxu0 %v3319_v9  ;;  %v3345_v0 = vld [vmem:[#allocation11 + $0x80] sm:$0xff]  }
 0x236   :  { %2868 = vmatprep.subr.bf16.mxu0 %v3320_v11 }
 0x238   :  { %2159 = vmatpush1.bf16.msra.mxu1 %v3275_v4  ;;  %v1376_v4 = vrot.slane %v1367_v2, %v3589_v17  ;;  %v1384_v17 = vrot.slane %v1367_v2, %v3591_v18  ;;  %v2829_v18 = vld [vmem:[%s3647_s8] ss:$0 sm:$0xff] }
 0x239   :  { %2160 = vmatprep.subr.bf16.mxu1 %v3280_v7  ;;  %2869 = vmatpush3.bf16.msra.mxu0 %v3321_v13 }
 0x23a   :  { %2870 = vmatprep.subr.bf16.mxu0 %v3322_v19 }
 0x23c   :  { %2161 = vmatpush1.bf16.msra.mxu1 %v3278_v8 }
 0x23d   :  { %2162 = vmatprep.subr.bf16.mxu1 %v3283_v10  ;;  %2871 = vmatpush3.bf16.msra.mxu0 %v3323_v21 }
 0x23e   :  { %2872 = vmatprep.subr.bf16.mxu0 %v3324_v23 }
 0x240   :  { %2163 = vmatpush1.bf16.msra.mxu1 %v3281_v12 }
 0x241   :  { %2164 = vmatprep.subr.bf16.mxu1 %v3286_v16  ;;  %2873 = vmatpush3.bf16.msra.mxu0 %v3325_v25 }
 0x242   :  { %2874 = vmatprep.subr.bf16.mxu0 %v3326_v43 }
 0x244   :  { %2165 = vmatpush1.bf16.msra.mxu1 %v3284_v20 }
 0x245   :  { %2166 = vmatprep.subr.bf16.mxu1 %v3289_v22  ;;  %2875 = vmatpush3.bf16.msra.mxu0 %v3327_v45 }
 0x246   :  { %2876 = vmatprep.subr.bf16.mxu0 %v3328_v46 }
 0x248   :  { %2167 = vmatpush1.bf16.msra.mxu1 %v3287_v24 }
 0x249   :  { %2168 = vmatprep.subr.bf16.mxu1 %v3292_v26  ;;  %2877 = vmatpush3.bf16.msra.mxu0 %v3329_v47 }
 0x24c   :  { %2169 = vmatpush2.bf16.msra.mxu1 %v3290_v27 }
 0x24d   :  { %2170 = vmatprep.subr.bf16.mxu1 %v3295_v28 }
 0x250   :  { %2171 = vmatpush2.bf16.msra.mxu1 %v3293_v29 }
 0x251   :  { %2172 = vmatprep.subr.bf16.mxu1 %v3298_v30 }
 0x254   :  { %2173 = vmatpush2.bf16.msra.mxu1 %v3296_v31 }
 0x255   :  { %2174 = vmatprep.subr.bf16.mxu1 %v3301_v32 }
 0x258   :  { %2175 = vmatpush2.bf16.msra.mxu1 %v3299_v33 }
 0x259   :  { %2176 = vmatprep.subr.bf16.mxu1 %v3304_v34 }
 0x25c   :  { %2177 = vmatpush2.bf16.msra.mxu1 %v3302_v35 }
 0x25d   :  { %2178 = vmatprep.subr.bf16.mxu1 %v3307_v36 }
 0x260   :  { %2179 = vmatpush2.bf16.msra.mxu1 %v3305_v38 }
 0x261   :  { %2180 = vmatprep.subr.bf16.mxu1 %v3310_v39 }
 0x264   :  { %2181 = vmatpush2.bf16.msra.mxu1 %v3308_v40 }
 0x265   :  { %2182 = vmatprep.subr.bf16.mxu1 %v3313_v41 }
 0x268   :  { %2183 = vmatpush2.bf16.msra.mxu1 %v3311_v42 }
 0x269   :  { %2884 = vmatprep.subr.bf16.mxu1 %v3330_v48 }
 0x26b   :  { %2185 = vmatmul.mubr.bf16.vlgmr.msra.gmra.mxu1 %v3621_v59  ;;  %v3342_v59 = vld [vmem:[#allocation11 + $0xc8] sm:$0xff]  }
 0x26c   :  { %2885 = vmatpush3.bf16.msra.mxu1 %v3331_v49 }
 0x26d   :  { %2886 = vmatprep.subr.bf16.mxu1 %v3332_v50 }
 0x270   :  { %2887 = vmatpush3.bf16.msra.mxu1 %v3333_v51 }
 0x271   :  { %2888 = vmatprep.subr.bf16.mxu1 %v3334_v52 }
 0x274   :  { %2889 = vmatpush3.bf16.msra.mxu1 %v3335_v54 }
 0x275   :  { %2890 = vmatprep.subr.bf16.mxu1 %v3336_v55 }
 0x278   :  { %2891 = vmatpush3.bf16.msra.mxu1 %v3337_v56 }
 0x279   :  { %2892 = vmatprep.subr.bf16.mxu1 %v3338_v57 }
 0x27c   :  { %2893 = vmatpush3.bf16.msra.mxu1 %v3339_v44 }
 0x27d   :  { %2894 = vmatprep.subr.bf16.mxu1 %v3340_v53 }
 0x280   :  { %2895 = vmatpush3.bf16.msra.mxu1 %v3341_v58 }
 0x281   :  { %2896 = vmatprep.subr.bf16.mxu1 %v3342_v59 }
 0x284   :  { %2897 = vmatpush3.bf16.msra.mxu1 %v3343_v60 }
 0x285   :  { %2898 = vmatprep.subr.bf16.mxu1 %v3344_v63 }
 0x288   :  { %2899 = vmatpush3.bf16.msra.mxu1 %v3345_v0 }
 0x2ab   :  { %v2063_v37 = vpop.f32.mrf.mxu0 }
 0x2ac   :  { %v2064_v5 = vadd.f32 %v2063_v37, %v1372_v3 }
 0x2ad   :  { %v2065_v61 = vpop.f32.mrf.mxu0 }
 0x2ae   :  { %v2066_v8 = vadd.f32 %v2065_v61, %v1376_v4 }
 0x2af   :  { %v2067_v62 = vpop.f32.mrf.mxu0 }
 0x2b1   :  { %v2068_v1 = vpop.f32.mrf.mxu0 }
 0x2eb   :  { %v2104_v7 = vpop.f32.mrf.mxu1  ;;  %v2145_v6 = vpop.f32.mrf.mxu0 }
 0x2ec   :  { %v2105_v9 = vadd.f32 %v2104_v7, %v2064_v5  ;;  %v2146_v25 = vadd.f32 %v2145_v6, %v1380_v14 }
 0x2ed   :  { %v2106_v10 = vpop.f32.mrf.mxu1  ;;  %v2147_v11 = vpop.f32.mrf.mxu0 }
 0x2ee   :  { %v2107_v12 = vadd.f32 %v2106_v10, %v2066_v8  ;;  %v2193_v13 = vmax.f32 %v2105_v9, 0.0  ;;  %v2148_v27 = vadd.f32 %v2147_v11, %v1384_v17 }
 0x2ef   :  { %v2108_v16 = vpop.f32.mrf.mxu1  ;;  %v2149_v19 = vpop.f32.mrf.mxu0 }
 0x2f0   :  { %v2194_v20 = vmax.f32 %v2107_v12, 0.0  ;;  %v2197_v24 = vpack.c.bf16 %v2193_v13, %v2193_v13 }
 0x2f1   :  { %v2109_v21 = vpop.f32.mrf.mxu1  ;;  %v2150_v22 = vpop.f32.mrf.mxu0 }
 0x2f2   :  { %v2198_v23 = vpack.c.bf16 %v2194_v20, %v2194_v20 }
 0x2f4   :  { %2496 = vmatprep.mubr.bf16.mxu0 %v2198_v23 }
 0x2f5   :  { %2497 = vmatmul.mubr.bf16.vlgmr.msra.gmra.mxu0 %v2197_v24 }
 0x32b   :  { %v2186_v26 = vpop.f32.mrf.mxu1 }
 0x32c   :  { %v2187_v28 = vadd.f32 %v2186_v26, %v2146_v25 }
 0x32d   :  { %v2188_v29 = vpop.f32.mrf.mxu1 }
 0x32e   :  { %v2189_v30 = vadd.f32 %v2188_v29, %v2148_v27  ;;  %v2195_v31 = vmax.f32 %v2187_v28, 0.0 }
 0x32f   :  { %v2190_v32 = vpop.f32.mrf.mxu1 }
 0x330   :  { %v2196_v33 = vmax.f32 %v2189_v30, 0.0  ;;  %v2199_v36 = vpack.c.bf16 %v2195_v31, %v2195_v31 }
 0x331   :  { %v2191_v34 = vpop.f32.mrf.mxu1 }
 0x332   :  { %v2200_v35 = vpack.c.bf16 %v2196_v33, %v2196_v33 }
 0x334   :  { %2536 = vmatprep.mubr.bf16.mxu1 %v2200_v35 }
 0x335   :  { %2537 = vmatmul.mubr.bf16.vlgmr.msra.gmra.mxu1 %v2199_v36 }
 0x3b5   :  { %v2878_v38 = vpop.f32.mrf.mxu0 }
 0x3b7   :  { %v2879_v39 = vpop.f32.mrf.mxu0 }
 0x3b8   :  { %v2880_v41 = vadd.f32 %v2879_v39, %v2878_v38 }
 0x3b9   :  { %v2881_v40 = vpop.f32.mrf.mxu0 }
 0x3ba   :  { %v2499_v45 = vadd.f32 %v2880_v41, %v2829_v18 }
 0x3bb   :  { %v2882_v15 = vpop.f32.mrf.mxu0 }
 0x3f5   :  { %v2900_v42 = vpop.f32.mrf.mxu1 }
 0x3f7   :  { %v2901_v43 = vpop.f32.mrf.mxu1 }
 0x3f8   :  { %v2902_v46 = vadd.f32 %v2901_v43, %v2900_v42 }
 0x3f9   :  { %v2903_v47 = vpop.f32.mrf.mxu1 }
 0x3fa   :  { %v2539_v48 = vadd.f32 %v2902_v46, %v2499_v45 }
 0x3fb   :  { %v2904_v49 = vpop.f32.mrf.mxu1 }
 0x3fc   :  { %2544 = vst [vmem:[#allocation13] sm:$0xff] %v2539_v48 }
 0x3fd   :  { %3477 = shalt.err (!%p3474_p6)
}
 0x3fe   :  { %2554 = dma.vmem_to_hbm [thread:$0]  %s2552_s21, 128, %s3648_s9, [#allocation4]  }
 0x3ff   :  { %3494 = dma.done.wait [#allocation4], 128  }
 0x400   :  { %3495 = vsyncadd [#allocation4], 4294967168 }
 0x401   :  { %2558 = vsyncpa [#allocation3], 1 }
 0x402   :  { %2559 = vsyncpa [#allocation6], 1 }
 0x403   :  { %2560 = vsyncpa [#allocation9], 1 }
 0x404   :  { %2561 = vsyncpa [#allocation12], 1 }
 0x405   :  { %2562 = vsyncpa [#allocation4], 1 }

</bundles_post_ra>
